<compile_context>
chip_gen: v5e
topology: v5e:2x2
jax: 0.10.0
libtpu: 0.0.40
codegen_flags: <defaults>
</compile_context>

<pallas_src>
import jax
import jax.numpy as jnp
from jax.experimental import pallas as pl
from jax.experimental.pallas import tpu as pltpu

# Stay well under the 32 MiB default scoped-VMEM limit (and v7x's 64 MiB
# physical VMEM); above this, switch to the member-grid path which streams
# per-member weight blocks instead of holding everything resident.
_VMEM_RESIDENT_LIMIT_BYTES = 24 * 1024 * 1024


# ----------------------------------------------------------------------------
# Kernels
# ----------------------------------------------------------------------------
def _make_collapsed_kernel(num: int, hidden: int):
    """grid=() kernel: all weights VMEM-resident, members statically unrolled."""

    def kernel(x_ref,
               w1_ref, b1_ref,
               w2_ref, b2_ref,
               w3_ref, b3_ref,
               wm_ref, bm_ref,
               xs_ref):
        x = x_ref[...]                                   # (batch, obs) f32

        # Layer 1 collapsed across members: one MXU push for all heads.
        h_all = jnp.dot(x, w1_ref[...],
                        preferred_element_type=jnp.float32) + b1_ref[...]
        h_all = jnp.where(h_all > 0, h_all, 0.01 * h_all)        # leaky_relu(0.01)

        outs = []
        for i in range(num):                             # static unroll
            h = h_all[:, i * hidden:(i + 1) * hidden]    # lane-aligned slice

            h = jnp.dot(h.astype(jnp.bfloat16), w2_ref[i],
                        preferred_element_type=jnp.float32) + b2_ref[i]
            h = jnp.where(h > 0, h, 0.01 * h)            # leaky_relu(0.01)

            h = jnp.dot(h.astype(jnp.bfloat16), w3_ref[i],
                        preferred_element_type=jnp.float32) + b3_ref[i]
            h = jnp.where(h > 0, h, 0.3 * h)             # leaky_relu(0.3)

            out = jnp.dot(h, wm_ref[i],
                          preferred_element_type=jnp.float32) + bm_ref[i]
            outs.append(out)                             # (batch, act_dim) f32

        # Single coalesced store instead of `num` small masked stores.
        xs_ref[...] = jnp.stack(outs, axis=0)

    return kernel


def _member_kernel(x_ref,
                   w1_ref, b1_ref,
                   w2_ref, b2_ref,
                   w3_ref, b3_ref,
                   wm_ref, bm_ref,
                   xs_ref):
    """grid=(num,) kernel: one ensemble member per grid step (v7x: 2 TCs)."""
    x = x_ref[...]                                       # (batch, obs) f32

    h = jnp.dot(x, w1_ref[...],
                preferred_element_type=jnp.float32) + b1_ref[...]
    h = jnp.where(h > 0, h, 0.01 * h)                    # leaky_relu(0.01)

    h = jnp.dot(h.astype(jnp.bfloat16), w2_ref[0],
                preferred_element_type=jnp.float32) + b2_ref[0]
    h = jnp.where(h > 0, h, 0.01 * h)                    # leaky_relu(0.01)

    h = jnp.dot(h.astype(jnp.bfloat16), w3_ref[0],
                preferred_element_type=jnp.float32) + b3_ref[0]
    h = jnp.where(h > 0, h, 0.3 * h)                     # leaky_relu(0.3)

    xs_ref[0] = jnp.dot(h, wm_ref[0],
                        preferred_element_type=jnp.float32) + bm_ref[0]


# ----------------------------------------------------------------------------
# Wrapper
# ----------------------------------------------------------------------------
def _auto_shard_members(num: int, params) -> bool:
    if num < 2:
        return False
    resident = sum(int(v.size) * v.dtype.itemsize for v in params.values())
    if resident > _VMEM_RESIDENT_LIMIT_BYTES:
        return True   # too big to hold resident -> stream per-member blocks
    try:
        kind = (jax.devices()[0].device_kind or "").lower()
    except Exception:
        return False
    # v7x has 2 TensorCores; shard members across them.
    return ("v7" in kind) or ("7x" in kind)


def actor_ensembles_forward(x, params, *, raw: bool = False, shard_members=None):
    """ActorEnsembles.forward: raw=True -> xs (num,batch,act); else (mean, std)."""
    obs_dim = params["w1"].shape[0]
    num, hidden = params["w2"].shape[0], params["w2"].shape[1]
    act_dim = params["wm"].shape[2]
    batch = x.shape[0]

    if shard_members is None:
        shard_members = _auto_shard_members(num, params)

    args = (x,
            params["w1"], params["b1"],
            params["w2"], params["b2"],
            params["w3"], params["b3"],
            params["wm"], params["bm"])

    cost = pl.CostEstimate(
        flops=2 * batch * num * (obs_dim * hidden + 2 * hidden * hidden
                                 + hidden * act_dim),
        transcendentals=0,
        bytes_accessed=sum(int(a.size) * a.dtype.itemsize for a in args)
                       + num * batch * act_dim * 4,
    )

    out_shape = jax.ShapeDtypeStruct((num, batch, act_dim), jnp.float32)

    if shard_members:
        xs = pl.pallas_call(
            _member_kernel,
            out_shape=out_shape,
            grid=(num,),
            in_specs=[
                pl.BlockSpec((batch, obs_dim), lambda i: (0, 0)),       # x
                pl.BlockSpec((obs_dim, hidden), lambda i: (0, i)),      # w1 slice
                pl.BlockSpec((1, hidden), lambda i: (0, i)),            # b1 slice
                pl.BlockSpec((1, hidden, hidden), lambda i: (i, 0, 0)), # w2
                pl.BlockSpec((1, 1, hidden), lambda i: (i, 0, 0)),      # b2
                pl.BlockSpec((1, hidden, hidden), lambda i: (i, 0, 0)), # w3
                pl.BlockSpec((1, 1, hidden), lambda i: (i, 0, 0)),      # b3
                pl.BlockSpec((1, hidden, act_dim), lambda i: (i, 0, 0)),# wm
                pl.BlockSpec((1, 1, act_dim), lambda i: (i, 0, 0)),     # bm
            ],
            out_specs=pl.BlockSpec((1, batch, act_dim), lambda i: (i, 0, 0)),
            compiler_params=pltpu.CompilerParams(
                dimension_semantics=("parallel",)),
            cost_estimate=cost,
        )(*args)
    else:
        vmem = pl.BlockSpec(memory_space=pltpu.MemorySpace.VMEM)
        xs = pl.pallas_call(
            _make_collapsed_kernel(num, hidden),
            out_shape=out_shape,
            in_specs=[vmem] * 9,
            out_specs=vmem,
            cost_estimate=cost,
        )(*args)

    if raw:
        return xs
    # Ensemble statistics are tiny; compute them in the wrapper (XLA fuses).
    mean = jnp.mean(xs, axis=0)
    std = jnp.std(xs, axis=0, ddof=1)   # num==1 -> NaN, matching torch.std
    return mean, std


# ----------------------------------------------------------------------------
# Synthetic init (PyTorch-Linear-style uniform bounds)
# ----------------------------------------------------------------------------
def init_params(key, num, obs_dim, hidden, act_dim):
    """Weight layout is (in, out) == transpose of torch's (out, in).

    w1/b1 are stored collapsed across members along the last axis so layer-1
    is a single matmul; w2/w3 are bf16 (dominant HBM stream), w1/wm/biases f32.
    """
    ks = jax.random.split(key, 8)

    def u(k, shape, fan_in, dtype):
        bound = 1.0 / (float(fan_in) ** 0.5)
        return jax.random.uniform(k, shape, jnp.float32, -bound, bound).astype(dtype)

    return {
        "w1": u(ks[0], (obs_dim, num * hidden), obs_dim, jnp.float32),
        "b1": u(ks[1], (1, num * hidden), obs_dim, jnp.float32),
        "w2": u(ks[2], (num, hidden, hidden), hidden, jnp.bfloat16),
        "b2": u(ks[3], (num, 1, hidden), hidden, jnp.float32),
        "w3": u(ks[4], (num, hidden, hidden), hidden, jnp.bfloat16),
        "b3": u(ks[5], (num, 1, hidden), hidden, jnp.float32),
        "wm": u(ks[6], (num, hidden, act_dim), hidden, jnp.float32),
        "bm": u(ks[7], (num, 1, act_dim), hidden, jnp.float32),
    }


# ----------------------------------------------------------------------------
# Pure-JAX reference (mirrors the kernel's mixed-precision math)
# ----------------------------------------------------------------------------
def _reference_forward(x, params):
    num, hidden = params["w2"].shape[0], params["w2"].shape[1]
    hi = jax.lax.Precision.HIGHEST

    def leaky(v, slope):
        return jnp.where(v > 0, v, slope * v)

    outs = []
    for i in range(num):
        w1 = params["w1"][:, i * hidden:(i + 1) * hidden]
        b1 = params["b1"][:, i * hidden:(i + 1) * hidden]
        h = leaky(jnp.dot(x, w1, precision=hi,
                          preferred_element_type=jnp.float32) + b1, 0.01)
        h = leaky(jnp.dot(h.astype(jnp.bfloat16), params["w2"][i],
                          preferred_element_type=jnp.float32) + params["b2"][i], 0.01)
        h = leaky(jnp.dot(h.astype(jnp.bfloat16), params["w3"][i],
                          preferred_element_type=jnp.float32) + params["b3"][i], 0.3)
        out = jnp.dot(h, params["wm"][i], precision=hi,
                      preferred_element_type=jnp.float32) + params["bm"][i]
        outs.append(out)
    xs = jnp.stack(outs, axis=0)
    return xs, xs.mean(axis=0), jnp.std(xs, axis=0, ddof=1)


if __name__ == "__main__":
    num = 2          # ensemble size
    batch = 8
    obs_dim = 32     # flattened observation size
    hidden = 256     # Actor's 256-wide MLP
    act_dim = 8

    key = jax.random.PRNGKey(0)
    k_x, k_p = jax.random.split(key)
    x = jax.random.normal(k_x, (batch, obs_dim), jnp.float32)
    params = init_params(k_p, num, obs_dim, hidden, act_dim)

    # Default path (single kernel call; mean/std derived in the wrapper).
    mean, std = actor_ensembles_forward(x, params, raw=False)
    xs = actor_ensembles_forward(x, params, raw=True)
    # Also exercise the member-sharded grid path (v7x two-TC layout).
    xs_grid = actor_ensembles_forward(x, params, raw=True, shard_members=True)
    jax.block_until_ready((xs, xs_grid, mean, std))

    xs_ref, mean_ref, std_ref = _reference_forward(x, params)
    # Tolerances absorb f32-matmul precision-path differences (Mosaic vs XLA)
    # on the f32 input/output layers; real bugs show up as O(0.1) diffs.
    assert jnp.allclose(xs, xs_ref, atol=5e-3, rtol=1e-2), "xs mismatch"
    assert jnp.allclose(xs_grid, xs_ref, atol=5e-3, rtol=1e-2), "xs (grid) mismatch"
    assert jnp.allclose(mean, mean_ref, atol=5e-3, rtol=1e-2), "mean mismatch"
    assert jnp.allclose(std, std_ref, atol=1e-2, rtol=1e-2), "std mismatch"

    print("KERNEL_OK")
</pallas_src>

<mosaic_0001>
module attributes {stable_mosaic.version = 11 : i64} {
  func.func @kernel(%arg0: memref<8x32xf32, #tpu.memory_space<vmem>>, %arg1: memref<32x512xf32, #tpu.memory_space<vmem>>, %arg2: memref<1x512xf32, #tpu.memory_space<vmem>>, %arg3: memref<2x256x256xbf16, #tpu.memory_space<vmem>>, %arg4: memref<2x1x256xf32, #tpu.memory_space<vmem>>, %arg5: memref<2x256x256xbf16, #tpu.memory_space<vmem>>, %arg6: memref<2x1x256xf32, #tpu.memory_space<vmem>>, %arg7: memref<2x256x8xf32, #tpu.memory_space<vmem>>, %arg8: memref<2x1x8xf32, #tpu.memory_space<vmem>>, %arg9: memref<2x8x8xf32, #tpu.memory_space<vmem>>) attributes {dimension_semantics = [], scalar_prefetch = 0 : i64, scratch_operands = 0 : i64, tpu.core_type = #tpu.core_type<tc>} {
    %c0 = arith.constant 0 : index
    %c0_0 = arith.constant 0 : index
    %0 = vector.load %arg0[%c0, %c0_0] : memref<8x32xf32, #tpu.memory_space<vmem>>, vector<8x32xf32>
    %c0_1 = arith.constant 0 : index
    %c0_2 = arith.constant 0 : index
    %1 = vector.load %arg1[%c0_1, %c0_2] : memref<32x512xf32, #tpu.memory_space<vmem>>, vector<32x512xf32>
    %cst = arith.constant dense<0.000000e+00> : vector<8x512xf32>
    %2 = tpu.matmul %0, %1, %cst {dimension_numbers = #tpu.dot_dimension_numbers<[1], [0], [0], [1], [0, 0, 1, 1], [], []>} : vector<8x32xf32>, vector<32x512xf32>, vector<8x512xf32> -> vector<8x512xf32>
    %c0_3 = arith.constant 0 : index
    %c0_4 = arith.constant 0 : index
    %3 = vector.load %arg2[%c0_3, %c0_4] : memref<1x512xf32, #tpu.memory_space<vmem>>, vector<1x512xf32>
    %4 = vector.broadcast %3 : vector<1x512xf32> to vector<8x512xf32>
    %5 = arith.addf %2, %4 : vector<8x512xf32>
    %cst_5 = arith.constant 0.000000e+00 : f32
    %6 = vector.broadcast %cst_5 : f32 to vector<8x512xf32>
    %7 = arith.cmpf ogt, %5, %6 : vector<8x512xf32>
    %cst_6 = arith.constant 0.00999999977 : f32
    %8 = vector.broadcast %cst_6 : f32 to vector<8x512xf32>
    %9 = arith.mulf %8, %5 : vector<8x512xf32>
    %10 = arith.select %7, %5, %9 : vector<8x512xi1>, vector<8x512xf32>
    %11 = vector.extract_strided_slice %10 {offsets = [0, 0], sizes = [8, 256], strides = [1, 1]} : vector<8x512xf32> to vector<8x256xf32>
    %12 = arith.truncf %11 : vector<8x256xf32> to vector<8x256xbf16>
    %c0_7 = arith.constant 0 : index
    %c0_8 = arith.constant 0 : index
    %c0_9 = arith.constant 0 : index
    %13 = vector.load %arg3[%c0_7, %c0_8, %c0_9] : memref<2x256x256xbf16, #tpu.memory_space<vmem>>, vector<1x256x256xbf16>
    %14 = vector.shape_cast %13 : vector<1x256x256xbf16> to vector<256x256xbf16>
    %cst_10 = arith.constant dense<0.000000e+00> : vector<8x256xf32>
    %15 = tpu.matmul %12, %14, %cst_10 {dimension_numbers = #tpu.dot_dimension_numbers<[1], [0], [0], [1], [0, 0, 1, 1], [], []>} : vector<8x256xbf16>, vector<256x256xbf16>, vector<8x256xf32> -> vector<8x256xf32>
    %c0_11 = arith.constant 0 : index
    %c0_12 = arith.constant 0 : index
    %c0_13 = arith.constant 0 : index
    %16 = vector.load %arg4[%c0_11, %c0_12, %c0_13] : memref<2x1x256xf32, #tpu.memory_space<vmem>>, vector<1x1x256xf32>
    %17 = vector.shape_cast %16 : vector<1x1x256xf32> to vector<1x256xf32>
    %18 = vector.broadcast %17 : vector<1x256xf32> to vector<8x256xf32>
    %19 = arith.addf %15, %18 : vector<8x256xf32>
    %cst_14 = arith.constant 0.000000e+00 : f32
    %20 = vector.broadcast %cst_14 : f32 to vector<8x256xf32>
    %21 = arith.cmpf ogt, %19, %20 : vector<8x256xf32>
    %cst_15 = arith.constant 0.00999999977 : f32
    %22 = vector.broadcast %cst_15 : f32 to vector<8x256xf32>
    %23 = arith.mulf %22, %19 : vector<8x256xf32>
    %24 = arith.select %21, %19, %23 : vector<8x256xi1>, vector<8x256xf32>
    %25 = arith.truncf %24 : vector<8x256xf32> to vector<8x256xbf16>
    %c0_16 = arith.constant 0 : index
    %c0_17 = arith.constant 0 : index
    %c0_18 = arith.constant 0 : index
    %26 = vector.load %arg5[%c0_16, %c0_17, %c0_18] : memref<2x256x256xbf16, #tpu.memory_space<vmem>>, vector<1x256x256xbf16>
    %27 = vector.shape_cast %26 : vector<1x256x256xbf16> to vector<256x256xbf16>
    %cst_19 = arith.constant dense<0.000000e+00> : vector<8x256xf32>
    %28 = tpu.matmul %25, %27, %cst_19 {dimension_numbers = #tpu.dot_dimension_numbers<[1], [0], [0], [1], [0, 0, 1, 1], [], []>} : vector<8x256xbf16>, vector<256x256xbf16>, vector<8x256xf32> -> vector<8x256xf32>
    %c0_20 = arith.constant 0 : index
    %c0_21 = arith.constant 0 : index
    %c0_22 = arith.constant 0 : index
    %29 = vector.load %arg6[%c0_20, %c0_21, %c0_22] : memref<2x1x256xf32, #tpu.memory_space<vmem>>, vector<1x1x256xf32>
    %30 = vector.shape_cast %29 : vector<1x1x256xf32> to vector<1x256xf32>
    %31 = vector.broadcast %30 : vector<1x256xf32> to vector<8x256xf32>
    %32 = arith.addf %28, %31 : vector<8x256xf32>
    %cst_23 = arith.constant 0.000000e+00 : f32
    %33 = vector.broadcast %cst_23 : f32 to vector<8x256xf32>
    %34 = arith.cmpf ogt, %32, %33 : vector<8x256xf32>
    %cst_24 = arith.constant 3.000000e-01 : f32
    %35 = vector.broadcast %cst_24 : f32 to vector<8x256xf32>
    %36 = arith.mulf %35, %32 : vector<8x256xf32>
    %37 = arith.select %34, %32, %36 : vector<8x256xi1>, vector<8x256xf32>
    %c0_25 = arith.constant 0 : index
    %c0_26 = arith.constant 0 : index
    %c0_27 = arith.constant 0 : index
    %38 = vector.load %arg7[%c0_25, %c0_26, %c0_27] : memref<2x256x8xf32, #tpu.memory_space<vmem>>, vector<1x256x8xf32>
    %39 = vector.shape_cast %38 : vector<1x256x8xf32> to vector<256x8xf32>
    %cst_28 = arith.constant dense<0.000000e+00> : vector<8x8xf32>
    %40 = tpu.matmul %37, %39, %cst_28 {dimension_numbers = #tpu.dot_dimension_numbers<[1], [0], [0], [1], [0, 0, 1, 1], [], []>} : vector<8x256xf32>, vector<256x8xf32>, vector<8x8xf32> -> vector<8x8xf32>
    %c0_29 = arith.constant 0 : index
    %c0_30 = arith.constant 0 : index
    %c0_31 = arith.constant 0 : index
    %41 = vector.load %arg8[%c0_29, %c0_30, %c0_31] : memref<2x1x8xf32, #tpu.memory_space<vmem>>, vector<1x1x8xf32>
    %42 = vector.shape_cast %41 : vector<1x1x8xf32> to vector<1x8xf32>
    %43 = vector.broadcast %42 : vector<1x8xf32> to vector<8x8xf32>
    %44 = arith.addf %40, %43 : vector<8x8xf32>
    %45 = vector.extract_strided_slice %10 {offsets = [0, 256], sizes = [8, 256], strides = [1, 1]} : vector<8x512xf32> to vector<8x256xf32>
    %46 = arith.truncf %45 : vector<8x256xf32> to vector<8x256xbf16>
    %c1 = arith.constant 1 : index
    %c0_32 = arith.constant 0 : index
    %c0_33 = arith.constant 0 : index
    %47 = vector.load %arg3[%c1, %c0_32, %c0_33] : memref<2x256x256xbf16, #tpu.memory_space<vmem>>, vector<1x256x256xbf16>
    %48 = vector.shape_cast %47 : vector<1x256x256xbf16> to vector<256x256xbf16>
    %cst_34 = arith.constant dense<0.000000e+00> : vector<8x256xf32>
    %49 = tpu.matmul %46, %48, %cst_34 {dimension_numbers = #tpu.dot_dimension_numbers<[1], [0], [0], [1], [0, 0, 1, 1], [], []>} : vector<8x256xbf16>, vector<256x256xbf16>, vector<8x256xf32> -> vector<8x256xf32>
    %c1_35 = arith.constant 1 : index
    %c0_36 = arith.constant 0 : index
    %c0_37 = arith.constant 0 : index
    %50 = vector.load %arg4[%c1_35, %c0_36, %c0_37] : memref<2x1x256xf32, #tpu.memory_space<vmem>>, vector<1x1x256xf32>
    %51 = vector.shape_cast %50 : vector<1x1x256xf32> to vector<1x256xf32>
    %52 = vector.broadcast %51 : vector<1x256xf32> to vector<8x256xf32>
    %53 = arith.addf %49, %52 : vector<8x256xf32>
    %cst_38 = arith.constant 0.000000e+00 : f32
    %54 = vector.broadcast %cst_38 : f32 to vector<8x256xf32>
    %55 = arith.cmpf ogt, %53, %54 : vector<8x256xf32>
    %cst_39 = arith.constant 0.00999999977 : f32
    %56 = vector.broadcast %cst_39 : f32 to vector<8x256xf32>
    %57 = arith.mulf %56, %53 : vector<8x256xf32>
    %58 = arith.select %55, %53, %57 : vector<8x256xi1>, vector<8x256xf32>
    %59 = arith.truncf %58 : vector<8x256xf32> to vector<8x256xbf16>
    %c1_40 = arith.constant 1 : index
    %c0_41 = arith.constant 0 : index
    %c0_42 = arith.constant 0 : index
    %60 = vector.load %arg5[%c1_40, %c0_41, %c0_42] : memref<2x256x256xbf16, #tpu.memory_space<vmem>>, vector<1x256x256xbf16>
    %61 = vector.shape_cast %60 : vector<1x256x256xbf16> to vector<256x256xbf16>
    %cst_43 = arith.constant dense<0.000000e+00> : vector<8x256xf32>
    %62 = tpu.matmul %59, %61, %cst_43 {dimension_numbers = #tpu.dot_dimension_numbers<[1], [0], [0], [1], [0, 0, 1, 1], [], []>} : vector<8x256xbf16>, vector<256x256xbf16>, vector<8x256xf32> -> vector<8x256xf32>
    %c1_44 = arith.constant 1 : index
    %c0_45 = arith.constant 0 : index
    %c0_46 = arith.constant 0 : index
    %63 = vector.load %arg6[%c1_44, %c0_45, %c0_46] : memref<2x1x256xf32, #tpu.memory_space<vmem>>, vector<1x1x256xf32>
    %64 = vector.shape_cast %63 : vector<1x1x256xf32> to vector<1x256xf32>
    %65 = vector.broadcast %64 : vector<1x256xf32> to vector<8x256xf32>
    %66 = arith.addf %62, %65 : vector<8x256xf32>
    %cst_47 = arith.constant 0.000000e+00 : f32
    %67 = vector.broadcast %cst_47 : f32 to vector<8x256xf32>
    %68 = arith.cmpf ogt, %66, %67 : vector<8x256xf32>
    %cst_48 = arith.constant 3.000000e-01 : f32
    %69 = vector.broadcast %cst_48 : f32 to vector<8x256xf32>
    %70 = arith.mulf %69, %66 : vector<8x256xf32>
    %71 = arith.select %68, %66, %70 : vector<8x256xi1>, vector<8x256xf32>
    %c1_49 = arith.constant 1 : index
    %c0_50 = arith.constant 0 : index
    %c0_51 = arith.constant 0 : index
    %72 = vector.load %arg7[%c1_49, %c0_50, %c0_51] : memref<2x256x8xf32, #tpu.memory_space<vmem>>, vector<1x256x8xf32>
    %73 = vector.shape_cast %72 : vector<1x256x8xf32> to vector<256x8xf32>
    %cst_52 = arith.constant dense<0.000000e+00> : vector<8x8xf32>
    %74 = tpu.matmul %71, %73, %cst_52 {dimension_numbers = #tpu.dot_dimension_numbers<[1], [0], [0], [1], [0, 0, 1, 1], [], []>} : vector<8x256xf32>, vector<256x8xf32>, vector<8x8xf32> -> vector<8x8xf32>
    %c1_53 = arith.constant 1 : index
    %c0_54 = arith.constant 0 : index
    %c0_55 = arith.constant 0 : index
    %75 = vector.load %arg8[%c1_53, %c0_54, %c0_55] : memref<2x1x8xf32, #tpu.memory_space<vmem>>, vector<1x1x8xf32>
    %76 = vector.shape_cast %75 : vector<1x1x8xf32> to vector<1x8xf32>
    %77 = vector.broadcast %76 : vector<1x8xf32> to vector<8x8xf32>
    %78 = arith.addf %74, %77 : vector<8x8xf32>
    %79 = vector.shape_cast %44 : vector<8x8xf32> to vector<1x8x8xf32>
    %80 = vector.shape_cast %78 : vector<8x8xf32> to vector<1x8x8xf32>
    %81 = tpu.concatenate %79, %80 in 0 : vector<1x8x8xf32>, vector<1x8x8xf32> -> vector<2x8x8xf32>
    %c0_56 = arith.constant 0 : index
    %c0_57 = arith.constant 0 : index
    %c0_58 = arith.constant 0 : index
    %82 = vector.load %arg9[%c0_56, %c0_57, %c0_58] : memref<2x8x8xf32, #tpu.memory_space<vmem>>, vector<2x8x8xf32>
    tpu.vector_store %arg9[%c0_56, %c0_57, %c0_58], %81 {strides = array<i32>} : memref<2x8x8xf32, #tpu.memory_space<vmem>>, vector<2x8x8xf32>,
    return
  }
}

</mosaic_0001>

<bundles_post_ra>
// kernel: tpu_custom_call.1
= control target key start
LH: loop header
LB: loop body
LE: loop exit
PB: predicated region body
PF: predicated region fallthrough
CT: control target
= control target key end

     0   :  { %14 = vsyncpa [#allocation3], 0  ;;  %s2898_s0 = inlined_call_operand.vmem [shape: f32[8,32], index: 0, kind: input, shape index: {}]   ;;  %s2899_s1 = inlined_call_operand.hbm [shape: f32[32,512], index: 1, kind: input, shape index: {}]   ;;  %s2900_s2 = inlined_call_operand.vmem [shape: f32[1,512], index: 2, kind: input, shape index: {}]   ;;  %s2901_s3 = inlined_call_operand.vmem [shape: bf16[2,256,256], index: 3, kind: input, shape index: {}]   ;;  %s2902_s4 = inlined_call_operand.vmem [shape: f32[2,1,256], index: 4, kind: input, shape index: {}]   ;;  %s2903_s5 = inlined_call_operand.hbm [shape: bf16[2,256,256], index: 5, kind: input, shape index: {}]   ;;  %s2904_s6 = inlined_call_operand.vmem [shape: f32[2,1,256], index: 6, kind: input, shape index: {}]   ;;  %s2905_s7 = inlined_call_operand.vmem [shape: f32[2,256,8], index: 7, kind: input, shape index: {}]   ;;  %s2906_s8 = inlined_call_operand.vmem [shape: f32[2,1,8], index: 8, kind: input, shape index: {}]   ;;  %s2907_s9 = inlined_call_operand.hbm [shape: f32[2,8,8], index: 9, kind: output, shape index: {}]  }
   0x1   :  { %15 = vsyncpa [#allocation6], 0 }
   0x2   :  { %16 = vsyncpa [#allocation4], 0  ;;  %s23_s11 = sshll.u32 %s2899_s1, 4  ;;  %s2199_s12 = smov [#allocation2]   ;;  %s24_s11 = int_to_ptr.hbm [resolvable:$true] %s23_s11 }
   0x3   :  { %s25_s13 = sshll.u32 %s2199_s12, 4  ;;  %s42_s16 = sshll.u32 %s2903_s5, 4  ;;  %s26_s13 = int_to_ptr.vmem [resolvable:$true] %s25_s13  ;;  %s43_s16 = int_to_ptr.hbm [resolvable:$true] %s42_s16 }
   0x4   :  { %s2200_s17 = smov 512   ;;  %s2201_s18 = smov 32  }
   0x5   :  { %31 = dma.hbm_to_vmem [thread:$0]  %s24_s11, 2048, %s26_s13, [#allocation3], %s2200_s17, %s2200_s17, %s2201_s18  }
   0x6   :  { %s2202_s19 = smov [#allocation5]   ;;  %s2203_s21 = smov 128  }
   0x7   :  { %s44_s20 = sshll.u32 %s2202_s19, 4  ;;  %s2204_s22 = smov 8   ;;  %s45_s20 = int_to_ptr.vmem [resolvable:$true] %s44_s20 }
   0x8   :  { %50 = dma.hbm_to_vmem [thread:$0]  %s43_s16, 8192, %s45_s20, [#allocation6], %s2203_s21, %s2203_s21, %s2204_s22  }
   0x9   :  { %2193 = dma.done.wait [#allocation3], 2048  }
   0xa   :  { %2194 = vsyncadd [#allocation3], 4294965248 }
   0xb   :  { %2195 = dma.done.wait [#allocation6], 8192  }
   0xc   :  { %2196 = vsyncadd [#allocation6], 4294959104  ;;  %v78_v0 = vld [vmem:[#allocation2 + $0x60] sm:$0xff]  ;;  %v79_v1 = vld [vmem:[#allocation2 + $0x68] sm:$0xff]  ;;  %vm92_vm0 = vcmask 261120   ;;  %vm1378_vm10 = vcmask 64512  }
   0xd   :  { %v74_v2 = vld [vmem:[#allocation2 + $0x40] sm:$0xff]  ;;  %108 = vmatpush.msra.mxu0 %v78_v0  ;;  %128 = vmatpush.msra.mxu1 %v79_v1  ;;  %v75_v3 = vld [vmem:[#allocation2 + $0x48] sm:$0xff]  ;;  %v80_v7 = vld [vmem:[#allocation2 + $0x70] sm:$0xff]  ;;  %s1387_s30 = sshll.u32 %s2907_s9, 4  ;;  %s1388_s30 = int_to_ptr.hbm [resolvable:$true] %s1387_s30 }
   0xe   :  { %v70_v4 = vld [vmem:[#allocation2 + $0x20] sm:$0xff]  ;;  %v71_v5 = vld [vmem:[#allocation2 + $0x28] sm:$0xff]  ;;  %v81_v8 = vld [vmem:[#allocation2 + $0x78] sm:$0xff]  ;;  %148 = vmatpush.msra.mxu2 %v80_v7 }
   0xf   :  { %v66_v6 = vld [vmem:[#allocation2] sm:$0xff]  ;;  %109 = vmatpush.msra.mxu0 %v74_v2  ;;  %129 = vmatpush.msra.mxu1 %v75_v3  ;;  %v76_v9 = vld [vmem:[#allocation2 + $0x50] sm:$0xff]  ;;  %v67_v10 = vld [vmem:[#allocation2 + $0x8] sm:$0xff] }
  0x10   :  { %v65_v11 = vld [vmem:[%s2898_s0] sm:$0xff]  ;;  %168 = vmatpush.msra.mxu3 %v81_v8  ;;  %v77_v12 = vld [vmem:[#allocation2 + $0x58] sm:$0xff]  ;;  %v72_v13 = vld [vmem:[#allocation2 + $0x30] sm:$0xff]  ;;  %149 = vmatpush.msra.mxu2 %v76_v9  ;;  %s2205_s0 = smov [#allocation7]  }
  0x11   :  { %110 = vmatpush.msra.mxu0 %v70_v4  ;;  %130 = vmatpush.msra.mxu1 %v71_v5  ;;  %v73_v14 = vld [vmem:[#allocation2 + $0x38] sm:$0xff]  ;;  %v1463_v15 = vld [vmem:[%s2901_s3 + $0x70] sm:$0xf]  ;;  %v1998_v23 = vld [vmem:[%s2901_s3 + $0x74] sm:$0xf]  ;;  %s1385_s27 = sshll.u32 %s2205_s0, 4  ;;  %s1386_s27 = int_to_ptr.vmem [resolvable:$true] %s1385_s27 }
  0x12   :  { %169 = vmatpush.msra.mxu3 %v77_v12  ;;  %v68_v16 = vld [vmem:[#allocation2 + $0x10] sm:$0xff]  ;;  %v69_v17 = vld [vmem:[#allocation2 + $0x18] sm:$0xff]  ;;  %v1455_v28 = vld [vmem:[%s2901_s3 + $0x60] sm:$0xf]  ;;  %150 = vmatpush.msra.mxu2 %v72_v13 }
  0x13   :  { %v1999_v18 = vld [vmem:[%s2901_s3 + $0x74] sm:$0xf0]  ;;  %v1527_v19 = vld [vmem:[%s2901_s3 + $0xf0] sm:$0xf]  ;;  %111 = vmatpush.msra.mxu0 %v66_v6  ;;  %131 = vmatpush.msra.mxu1 %v67_v10  ;;  %v1465_v24 = vld [vmem:[%s2901_s3 + $0x78] sm:$0xf0] }
  0x14   :  { %v2015_v20 = vld [vmem:[%s2901_s3 + $0xf4] sm:$0xf0]  ;;  %v1464_v21 = vor.u32 %v1999_v18, %v1463_v15  ;;  %v2014_v25 = vld [vmem:[%s2901_s3 + $0xf4] sm:$0xf]  ;;  %1401 = vmatmul.msk.f32.vlgmr.msra.gmra.mxu0 %vm92_vm0, %v65_v11  ;;  %1402 = vmatmul.msk.f32.vlgmr.msra.gmra.mxu1 %vm92_vm0, %v65_v11  ;;  %v1468_v26 = vor.u32 %v1998_v23, %v1465_v24  ;;  %v1529_v27 = vld [vmem:[%s2901_s3 + $0xf8] sm:$0xf0] }
  0x15   :  { %v1528_v22 = vor.u32 %v2015_v20, %v1527_v19  ;;  %v1997_v29 = vld [vmem:[%s2901_s3 + $0x64] sm:$0xf0]  ;;  %170 = vmatpush.msra.mxu3 %v73_v14  ;;  %v1532_v30 = vor.u32 %v2014_v25, %v1529_v27  ;;  %v1519_v31 = vld [vmem:[%s2901_s3 + $0xe0] sm:$0xf]  ;;  %v1996_v33 = vld [vmem:[%s2901_s3 + $0x64] sm:$0xf]  ;;  %151 = vmatpush.msra.mxu2 %v68_v16 }
  0x16   :  { %v2013_v32 = vld [vmem:[%s2901_s3 + $0xe4] sm:$0xf0]  ;;  %388 = vmatpush.bf16.msrb.mxu0 %v1464_v21  ;;  %v1456_v34 = vor.u32 %v1997_v29, %v1455_v28  ;;  %v1457_v36 = vld [vmem:[%s2901_s3 + $0x68] sm:$0xf0]  ;;  %v2012_v37 = vld [vmem:[%s2901_s3 + $0xe4] sm:$0xf]  ;;  %1403 = vmatmul.msk.f32.vlgmr.msra.gmra.mxu2 %vm92_vm0, %v65_v11 }
  0x17   :  { %401 = vmatpush.bf16.msrb.mxu1 %v1528_v22  ;;  %v1520_v35 = vor.u32 %v2013_v32, %v1519_v31  ;;  %v1521_v38 = vld [vmem:[%s2901_s3 + $0xe8] sm:$0xf0]  ;;  %171 = vmatpush.msra.mxu3 %v69_v17  ;;  %v1447_v39 = vld [vmem:[%s2901_s3 + $0x50] sm:$0xf]  ;;  %v1995_v40 = vld [vmem:[%s2901_s3 + $0x54] sm:$0xf0]  ;;  %v1460_v42 = vor.u32 %v1996_v33, %v1457_v36 }
  0x18   :  { %v1511_v41 = vld [vmem:[%s2901_s3 + $0xd0] sm:$0xf]  ;;  %414 = vmatpush.bf16.msrb.mxu2 %v1468_v26  ;;  %v1524_v43 = vor.u32 %v2012_v37, %v1521_v38  ;;  %v2011_v44 = vld [vmem:[%s2901_s3 + $0xd4] sm:$0xf0]  ;;  %v1994_v45 = vld [vmem:[%s2901_s3 + $0x54] sm:$0xf]  ;;  %1404 = vmatmul.msk.f32.vlgmr.msra.gmra.mxu3 %vm92_vm0, %v65_v11  ;;  %v1448_v49 = vor.u32 %v1995_v40, %v1447_v39 }
  0x19   :  { %427 = vmatpush.bf16.msrb.mxu3 %v1532_v30  ;;  %v1449_v46 = vld [vmem:[%s2901_s3 + $0x58] sm:$0xf0]  ;;  %v2010_v47 = vld [vmem:[%s2901_s3 + $0xd4] sm:$0xf]  ;;  %v1512_v50 = vor.u32 %v2011_v44, %v1511_v41  ;;  %v1439_v51 = vld [vmem:[%s2901_s3 + $0x40] sm:$0xf] }
  0x1a   :  { %v1513_v48 = vld [vmem:[%s2901_s3 + $0xd8] sm:$0xf0]  ;;  %389 = vmatpush.bf16.msrb.mxu0 %v1456_v34  ;;  %v1993_v52 = vld [vmem:[%s2901_s3 + $0x44] sm:$0xf0]  ;;  %v1503_v53 = vld [vmem:[%s2901_s3 + $0xc0] sm:$0xf]  ;;  %v1452_v55 = vor.u32 %v1994_v45, %v1449_v46 }
  0x1b   :  { %402 = vmatpush.bf16.msrb.mxu1 %v1520_v35  ;;  %v2009_v54 = vld [vmem:[%s2901_s3 + $0xc4] sm:$0xf0]  ;;  %v1516_v56 = vor.u32 %v2010_v47, %v1513_v48  ;;  %v1992_v57 = vld [vmem:[%s2901_s3 + $0x44] sm:$0xf]  ;;  %v1441_v58 = vld [vmem:[%s2901_s3 + $0x48] sm:$0xf0]  ;;  %v1440_v61 = vor.u32 %v1993_v52, %v1439_v51 }
  0x1c   :  { %415 = vmatpush.bf16.msrb.mxu2 %v1460_v42  ;;  %v2008_v59 = vld [vmem:[%s2901_s3 + $0xc4] sm:$0xf]  ;;  %v1505_v60 = vld [vmem:[%s2901_s3 + $0xc8] sm:$0xf0]  ;;  %v1504_v62 = vor.u32 %v2009_v54, %v1503_v53  ;;  %v1431_v63 = vld [vmem:[%s2901_s3 + $0x30] sm:$0xf]  ;;  %v1444_v3 = vor.u32 %v1992_v57, %v1441_v58 }
  0x1d   :  { %428 = vmatpush.bf16.msrb.mxu3 %v1524_v43  ;;  %v1991_v0 = vld [vmem:[%s2901_s3 + $0x34] sm:$0xf0]  ;;  %v1495_v1 = vld [vmem:[%s2901_s3 + $0xb0] sm:$0xf]  ;;  %v1508_v4 = vor.u32 %v2008_v59, %v1505_v60  ;;  %v1990_v5 = vld [vmem:[%s2901_s3 + $0x34] sm:$0xf] }
  0x1e   :  { %390 = vmatpush.bf16.msrb.mxu0 %v1448_v49  ;;  %v2007_v2 = vld [vmem:[%s2901_s3 + $0xb4] sm:$0xf0]  ;;  %v1433_v6 = vld [vmem:[%s2901_s3 + $0x38] sm:$0xf0]  ;;  %v2006_v7 = vld [vmem:[%s2901_s3 + $0xb4] sm:$0xf]  ;;  %v1432_v9 = vor.u32 %v1991_v0, %v1431_v63 }
  0x1f   :  { %403 = vmatpush.bf16.msrb.mxu1 %v1512_v50  ;;  %v1497_v8 = vld [vmem:[%s2901_s3 + $0xb8] sm:$0xf0]  ;;  %v1496_v10 = vor.u32 %v2007_v2, %v1495_v1  ;;  %v1423_v11 = vld [vmem:[%s2901_s3 + $0x20] sm:$0xf]  ;;  %v1989_v12 = vld [vmem:[%s2901_s3 + $0x24] sm:$0xf0]  ;;  %v1436_v15 = vor.u32 %v1990_v5, %v1433_v6 }
  0x20   :  { %416 = vmatpush.bf16.msrb.mxu2 %v1452_v55  ;;  %v1487_v13 = vld [vmem:[%s2901_s3 + $0xa0] sm:$0xf]  ;;  %v2005_v14 = vld [vmem:[%s2901_s3 + $0xa4] sm:$0xf0]  ;;  %v1500_v16 = vor.u32 %v2006_v7, %v1497_v8  ;;  %v1988_v17 = vld [vmem:[%s2901_s3 + $0x24] sm:$0xf]  ;;  %v1424_v21 = vor.u32 %v1989_v12, %v1423_v11 }
  0x21   :  { %429 = vmatpush.bf16.msrb.mxu3 %v1516_v56  ;;  %v1425_v18 = vld [vmem:[%s2901_s3 + $0x28] sm:$0xf0]  ;;  %v2004_v19 = vld [vmem:[%s2901_s3 + $0xa4] sm:$0xf]  ;;  %v1488_v22 = vor.u32 %v2005_v14, %v1487_v13  ;;  %v1415_v25 = vld [vmem:[%s2901_s3 + $0x10] sm:$0xf] }
  0x22   :  { %391 = vmatpush.bf16.msrb.mxu0 %v1440_v61  ;;  %v1489_v20 = vld [vmem:[%s2901_s3 + $0xa8] sm:$0xf0]  ;;  %v1428_v23 = vor.u32 %v1988_v17, %v1425_v18  ;;  %v1987_v26 = vld [vmem:[%s2901_s3 + $0x14] sm:$0xf0]  ;;  %v1479_v27 = vld [vmem:[%s2901_s3 + $0x90] sm:$0xf] }
  0x23   :  { %404 = vmatpush.bf16.msrb.mxu1 %v1504_v62  ;;  %v1492_v24 = vor.u32 %v2004_v19, %v1489_v20  ;;  %v1416_v28 = vor.u32 %v1987_v26, %v1415_v25  ;;  %v2003_v29 = vld [vmem:[%s2901_s3 + $0x94] sm:$0xf0]  ;;  %v1986_v30 = vld [vmem:[%s2901_s3 + $0x14] sm:$0xf]  ;;  %v1417_v32 = vld [vmem:[%s2901_s3 + $0x18] sm:$0xf0] }
  0x24   :  { %417 = vmatpush.bf16.msrb.mxu2 %v1444_v3  ;;  %v1480_v31 = vor.u32 %v2003_v29, %v1479_v27  ;;  %v2002_v33 = vld [vmem:[%s2901_s3 + $0x94] sm:$0xf]  ;;  %v1481_v34 = vld [vmem:[%s2901_s3 + $0x98] sm:$0xf0]  ;;  %v1420_v35 = vor.u32 %v1986_v30, %v1417_v32  ;;  %v1407_v37 = vld [vmem:[%s2901_s3] sm:$0xf] }
  0x25   :  { %430 = vmatpush.bf16.msrb.mxu3 %v1508_v4  ;;  %v1484_v36 = vor.u32 %v2002_v33, %v1481_v34  ;;  %v1985_v38 = vld [vmem:[%s2901_s3 + $0x4] sm:$0xf0]  ;;  %v1471_v39 = vld [vmem:[%s2901_s3 + $0x80] sm:$0xf]  ;;  %v1984_v42 = vld [vmem:[%s2901_s3 + $0x4] sm:$0xf] }
  0x26   :  { %392 = vmatpush.bf16.msrb.mxu0 %v1432_v9  ;;  %v1408_v40 = vor.u32 %v1985_v38, %v1407_v37  ;;  %v2001_v41 = vld [vmem:[%s2901_s3 + $0x84] sm:$0xf0]  ;;  %v1409_v43 = vld [vmem:[%s2901_s3 + $0x8] sm:$0xf0]  ;;  %v2000_v46 = vld [vmem:[%s2901_s3 + $0x84] sm:$0xf] }
  0x27   :  { %405 = vmatpush.bf16.msrb.mxu1 %v1496_v10  ;;  %v1472_v44 = vor.u32 %v2001_v41, %v1471_v39  ;;  %v1412_v45 = vor.u32 %v1984_v42, %v1409_v43  ;;  %v1473_v47 = vld [vmem:[%s2901_s3 + $0x88] sm:$0xf0]  ;;  %v2030_v49 = vld [vmem:[#allocation5 + $0x74] sm:$0xf]  ;;  %v1593_v50 = vld [vmem:[#allocation5 + $0x78] sm:$0xf0] }
  0x28   :  { %418 = vmatpush.bf16.msrb.mxu2 %v1436_v15  ;;  %v1476_v48 = vor.u32 %v2000_v46, %v1473_v47  ;;  %v2028_v51 = vld [vmem:[#allocation5 + $0x64] sm:$0xf]  ;;  %v1596_v52 = vor.u32 %v2030_v49, %v1593_v50  ;;  %v1585_v53 = vld [vmem:[#allocation5 + $0x68] sm:$0xf0]  ;;  %v2046_v54 = vld [vmem:[#allocation5 + $0xf4] sm:$0xf] }
  0x29   :  { %431 = vmatpush.bf16.msrb.mxu3 %v1500_v16  ;;  %v1657_v55 = vld [vmem:[#allocation5 + $0xf8] sm:$0xf0]  ;;  %v2044_v57 = vld [vmem:[#allocation5 + $0xe4] sm:$0xf]  ;;  %v1588_v58 = vor.u32 %v2028_v51, %v1585_v53  ;;  %v2026_v59 = vld [vmem:[#allocation5 + $0x54] sm:$0xf] }
  0x2a   :  { %393 = vmatpush.bf16.msrb.mxu0 %v1424_v21  ;;  %v1660_v56 = vor.u32 %v2046_v54, %v1657_v55  ;;  %v1649_v60 = vld [vmem:[#allocation5 + $0xe8] sm:$0xf0]  ;;  %v1577_v61 = vld [vmem:[#allocation5 + $0x58] sm:$0xf0]  ;;  %v1591_v63 = vld [vmem:[#allocation5 + $0x70] sm:$0xf] }
  0x2b   :  { %406 = vmatpush.bf16.msrb.mxu1 %v1488_v22  ;;  %v1652_v62 = vor.u32 %v2044_v57, %v1649_v60  ;;  %v2031_v0 = vld [vmem:[#allocation5 + $0x74] sm:$0xf0]  ;;  %v2042_v2 = vld [vmem:[#allocation5 + $0xd4] sm:$0xf]  ;;  %v1641_v3 = vld [vmem:[#allocation5 + $0xd8] sm:$0xf0]  ;;  %v1580_v6 = vor.u32 %v2026_v59, %v1577_v61 }
  0x2c   :  { %419 = vmatpush.bf16.msrb.mxu2 %v1428_v23  ;;  %v1592_v1 = vor.u32 %v2031_v0, %v1591_v63  ;;  %v1583_v4 = vld [vmem:[#allocation5 + $0x60] sm:$0xf]  ;;  %v2029_v5 = vld [vmem:[#allocation5 + $0x64] sm:$0xf0]  ;;  %v1655_v8 = vld [vmem:[#allocation5 + $0xf0] sm:$0xf]  ;;  %v1644_v12 = vor.u32 %v2042_v2, %v1641_v3 }
  0x2d   :  { %432 = vmatpush.bf16.msrb.mxu3 %v1492_v24  ;;  %v1584_v7 = vor.u32 %v2029_v5, %v1583_v4  ;;  %v2047_v9 = vld [vmem:[#allocation5 + $0xf4] sm:$0xf0]  ;;  %v2024_v10 = vld [vmem:[#allocation5 + $0x44] sm:$0xf]  ;;  %v1569_v11 = vld [vmem:[#allocation5 + $0x48] sm:$0xf0] }
  0x2e   :  { %394 = vmatpush.bf16.msrb.mxu0 %v1416_v28  ;;  %v1656_v13 = vor.u32 %v2047_v9, %v1655_v8  ;;  %v1575_v14 = vld [vmem:[#allocation5 + $0x50] sm:$0xf]  ;;  %v2040_v15 = vld [vmem:[#allocation5 + $0xc4] sm:$0xf]  ;;  %v1633_v16 = vld [vmem:[#allocation5 + $0xc8] sm:$0xf0]  ;;  %v1572_v20 = vor.u32 %v2024_v10, %v1569_v11 }
  0x2f   :  { %407 = vmatpush.bf16.msrb.mxu1 %v1480_v31  ;;  %v2027_v17 = vld [vmem:[#allocation5 + $0x54] sm:$0xf0]  ;;  %v1647_v18 = vld [vmem:[#allocation5 + $0xe0] sm:$0xf]  ;;  %v2045_v19 = vld [vmem:[#allocation5 + $0xe4] sm:$0xf0]  ;;  %v1636_v25 = vor.u32 %v2040_v15, %v1633_v16 }
  0x30   :  { %420 = vmatpush.bf16.msrb.mxu2 %v1420_v35  ;;  %v2022_v21 = vld [vmem:[#allocation5 + $0x34] sm:$0xf]  ;;  %v1561_v22 = vld [vmem:[#allocation5 + $0x38] sm:$0xf0]  ;;  %v1576_v23 = vor.u32 %v2027_v17, %v1575_v14  ;;  %v1648_v24 = vor.u32 %v2045_v19, %v1647_v18  ;;  %v1567_v26 = vld [vmem:[#allocation5 + $0x40] sm:$0xf] }
  0x31   :  { %433 = vmatpush.bf16.msrb.mxu3 %v1484_v36  ;;  %v2025_v27 = vld [vmem:[#allocation5 + $0x44] sm:$0xf0]  ;;  %v1639_v28 = vld [vmem:[#allocation5 + $0xd0] sm:$0xf]  ;;  %v2038_v29 = vld [vmem:[#allocation5 + $0xb4] sm:$0xf]  ;;  %v1564_v34 = vor.u32 %v2022_v21, %v1561_v22 }
  0x32   :  { %395 = vmatpush.bf16.msrb.mxu0 %v1408_v40  ;;  %v1625_v30 = vld [vmem:[#allocation5 + $0xb8] sm:$0xf0]  ;;  %v2043_v31 = vld [vmem:[#allocation5 + $0xd4] sm:$0xf0]  ;;  %v2467_v32 = vld [vmem:[%s2900_s2] sm:$0xf]  ;;  %v1568_v37 = vor.u32 %v2025_v27, %v1567_v26 }
  0x33   :  { %408 = vmatpush.bf16.msrb.mxu1 %v1472_v44  ;;  %v1640_v33 = vor.u32 %v2043_v31, %v1639_v28  ;;  %v2020_v35 = vld [vmem:[#allocation5 + $0x24] sm:$0xf]  ;;  %v1553_v36 = vld [vmem:[#allocation5 + $0x28] sm:$0xf0]  ;;  %v1559_v38 = vld [vmem:[#allocation5 + $0x30] sm:$0xf]  ;;  %v1628_v39 = vor.u32 %v2038_v29, %v1625_v30 }
  0x34   :  { %421 = vmatpush.bf16.msrb.mxu2 %v1412_v45  ;;  %v2023_v40 = vld [vmem:[#allocation5 + $0x34] sm:$0xf0]  ;;  %v1631_v41 = vld [vmem:[#allocation5 + $0xc0] sm:$0xf]  ;;  %v2041_v42 = vld [vmem:[#allocation5 + $0xc4] sm:$0xf0] }
  0x35   :  { %434 = vmatpush.bf16.msrb.mxu3 %v1476_v48  ;;  %v2036_v43 = vld [vmem:[#allocation5 + $0xa4] sm:$0xf]  ;;  %v1617_v44 = vld [vmem:[#allocation5 + $0xa8] sm:$0xf0]  ;;  %v1632_v45 = vor.u32 %v2041_v42, %v1631_v41  ;;  %v84_v46 = vperm.slane %v2467_v32, 0  ;;  %v85_v47 = vperm.slane %v2467_v32, 1  ;;  %v1556_v48 = vor.u32 %v2020_v35, %v1553_v36 }
  0x36   :  { %646 = vmatpush.bf16.msra.mxu0 %v1592_v1  ;;  %v2018_v49 = vld [vmem:[#allocation5 + $0x14] sm:$0xf]  ;;  %v1560_v50 = vor.u32 %v2023_v40, %v1559_v38  ;;  %v1545_v51 = vld [vmem:[#allocation5 + $0x18] sm:$0xf0]  ;;  %v1551_v53 = vld [vmem:[#allocation5 + $0x20] sm:$0xf] }
  0x37   :  { %659 = vmatpush.bf16.msra.mxu1 %v1656_v13  ;;  %v2021_v54 = vld [vmem:[#allocation5 + $0x24] sm:$0xf0]  ;;  %v2034_v55 = vld [vmem:[#allocation5 + $0x94] sm:$0xf]  ;;  %v1548_v59 = vor.u32 %v2018_v49, %v1545_v51  ;;  %v2016_v0 = vld [vmem:[#allocation5 + $0x4] sm:$0xf] }
  0x38   :  { %672 = vmatpush.bf16.msra.mxu2 %v1596_v52  ;;  %v1620_v52 = vor.u32 %v2036_v43, %v1617_v44  ;;  %v1552_v60 = vor.u32 %v2021_v54, %v1551_v53  ;;  %v1537_v1 = vld [vmem:[#allocation5 + $0x8] sm:$0xf0]  ;;  %v1752_v4 = vld [vmem:[%s2901_s3 + $0x170] sm:$0xf]  ;;  %v2063_v5 = vld [vmem:[%s2901_s3 + $0x174] sm:$0xf0] }
  0x39   :  { %685 = vmatpush.bf16.msra.mxu3 %v1660_v56  ;;  %v1609_v56 = vld [vmem:[#allocation5 + $0x98] sm:$0xf0]  ;;  %v1540_v10 = vor.u32 %v2016_v0, %v1537_v1  ;;  %v1753_v11 = vor.u32 %v2063_v5, %v1752_v4  ;;  %v2061_v13 = vld [vmem:[%s2901_s3 + $0x164] sm:$0xf0]  ;;  %v2032_v15 = vld [vmem:[#allocation5 + $0x84] sm:$0xf] }
  0x3a   :  { %647 = vmatpush.bf16.msra.mxu0 %v1584_v7  ;;  %v1612_v63 = vor.u32 %v2034_v55, %v1609_v56  ;;  %v1601_v16 = vld [vmem:[#allocation5 + $0x88] sm:$0xf0]  ;;  %v1623_v18 = vld [vmem:[#allocation5 + $0xb0] sm:$0xf]  ;;  %v2039_v19 = vld [vmem:[#allocation5 + $0xb4] sm:$0xf0] }
  0x3b   :  { %660 = vmatpush.bf16.msra.mxu1 %v1648_v24  ;;  %v1604_v17 = vor.u32 %v2032_v15, %v1601_v16  ;;  %v1624_v21 = vor.u32 %v2039_v19, %v1623_v18  ;;  %v2079_v22 = vld [vmem:[%s2901_s3 + $0x1f4] sm:$0xf0]  ;;  %v1543_v24 = vld [vmem:[#allocation5 + $0x10] sm:$0xf]  ;;  %v1615_v30 = vld [vmem:[#allocation5 + $0xa0] sm:$0xf] }
  0x3c   :  { %673 = vmatpush.bf16.msra.mxu2 %v1588_v58  ;;  %v1736_v26 = vld [vmem:[%s2901_s3 + $0x150] sm:$0xf]  ;;  %v2059_v28 = vld [vmem:[%s2901_s3 + $0x154] sm:$0xf0]  ;;  %v2037_v31 = vld [vmem:[#allocation5 + $0xa4] sm:$0xf0] }
  0x3d   :  { %686 = vmatpush.bf16.msra.mxu3 %v1652_v62  ;;  %v1737_v29 = vor.u32 %v2059_v28, %v1736_v26  ;;  %v2077_v35 = vld [vmem:[%s2901_s3 + $0x1e4] sm:$0xf0]  ;;  %v1607_v43 = vld [vmem:[#allocation5 + $0x90] sm:$0xf]  ;;  %v2035_v44 = vld [vmem:[#allocation5 + $0x94] sm:$0xf0] }
  0x3e   :  { %648 = vmatpush.bf16.msra.mxu0 %v1576_v23  ;;  %v2017_v38 = vld [vmem:[#allocation5 + $0x4] sm:$0xf0]  ;;  %v1720_v49 = vld [vmem:[%s2901_s3 + $0x130] sm:$0xf]  ;;  %v1792_v54 = vld [vmem:[%s2901_s3 + $0x1c0] sm:$0xf] }
  0x3f   :  { %661 = vmatpush.bf16.msra.mxu1 %v1640_v33  ;;  %v1808_v33 = vld [vmem:[%s2901_s3 + $0x1e0] sm:$0xf]  ;;  %v2057_v41 = vld [vmem:[%s2901_s3 + $0x144] sm:$0xf0]  ;;  %v1704_v0 = vld [vmem:[%s2901_s3 + $0x110] sm:$0xf] }
  0x40   :  { %674 = vmatpush.bf16.msra.mxu2 %v1580_v6  ;;  %v1809_v36 = vor.u32 %v2077_v35, %v1808_v33  ;;  %v2033_v53 = vld [vmem:[#allocation5 + $0x84] sm:$0xf0]  ;;  %v2051_v1 = vld [vmem:[%s2901_s3 + $0x114] sm:$0xf0]  ;;  %v1696_v5 = vld [vmem:[%s2901_s3 + $0x100] sm:$0xf] }
  0x41   :  { %687 = vmatpush.bf16.msra.mxu3 %v1644_v12  ;;  %v1744_v12 = vld [vmem:[%s2901_s3 + $0x160] sm:$0xf]  ;;  %v2073_v56 = vld [vmem:[%s2901_s3 + $0x1c4] sm:$0xf0]  ;;  %v735_v26 = vld [vmem:[%s2905_s7 + $0xf8] sm:$0xff] }
  0x42   :  { %649 = vmatpush.bf16.msra.mxu0 %v1568_v37  ;;  %v1745_v14 = vor.u32 %v2061_v13, %v1744_v12  ;;  %v1535_v37 = vld [vmem:[#allocation5] sm:$0xf]  ;;  %v2069_v4 = vld [vmem:[%s2901_s3 + $0x1a4] sm:$0xf0]  ;;  %v734_v28 = vld [vmem:[%s2905_s7 + $0xf0] sm:$0xff] }
  0x43   :  { %662 = vmatpush.bf16.msra.mxu1 %v1632_v45  ;;  %v1536_v40 = vor.u32 %v2017_v38, %v1535_v37  ;;  %v1800_v45 = vld [vmem:[%s2901_s3 + $0x1d0] sm:$0xf]  ;;  %v222_v12 = vld [vmem:[%s2902_s4] sm:$0x3] }
  0x44   :  { %675 = vmatpush.bf16.msra.mxu2 %v1572_v20  ;;  %v1816_v20 = vld [vmem:[%s2901_s3 + $0x1f0] sm:$0xf]  ;;  %v1760_v13 = vld [vmem:[%s2901_s3 + $0x180] sm:$0xf] }
  0x45   :  { %688 = vmatpush.bf16.msra.mxu3 %v1636_v25  ;;  %v1817_v23 = vor.u32 %v2079_v22, %v1816_v20  ;;  %v2019_v25 = vld [vmem:[#allocation5 + $0x14] sm:$0xf0] }
  0x46   :  { %650 = vmatpush.bf16.msra.mxu0 %v1560_v50  ;;  %v1544_v27 = vor.u32 %v2019_v25, %v1543_v24  ;;  %v2055_v50 = vld [vmem:[%s2901_s3 + $0x134] sm:$0xf0]  ;;  %v717_v25 = vld [vmem:[%s2905_s7 + $0x68] sm:$0xff] }
  0x47   :  { %663 = vmatpush.bf16.msra.mxu1 %v1624_v21  ;;  %v1721_v51 = vor.u32 %v2055_v50, %v1720_v49  ;;  %v719_v22 = vld [vmem:[%s2905_s7 + $0x78] sm:$0xff] }
  0x48   :  { %676 = vmatpush.bf16.msra.mxu2 %v1564_v34  ;;  %v1616_v34 = vor.u32 %v2037_v31, %v1615_v30  ;;  %v716_v30 = vld [vmem:[%s2905_s7 + $0x60] sm:$0xff]  ;;  %v733_v31 = vld [vmem:[%s2905_s7 + $0xe8] sm:$0xff] }
  0x49   :  { %689 = vmatpush.bf16.msra.mxu3 %v1628_v39  ;;  %v1728_v39 = vld [vmem:[%s2901_s3 + $0x140] sm:$0xf] }
  0x4a   :  { %651 = vmatpush.bf16.msra.mxu0 %v1552_v60  ;;  %v1729_v42 = vor.u32 %v2057_v41, %v1728_v39  ;;  %v732_v41 = vld [vmem:[%s2905_s7 + $0xe0] sm:$0xff] }
  0x4b   :  { %664 = vmatpush.bf16.msra.mxu1 %v1616_v34 }
  0x4c   :  { %677 = vmatpush.bf16.msra.mxu2 %v1556_v48 }
  0x4d   :  { %690 = vmatpush.bf16.msra.mxu3 %v1620_v52  ;;  %v1599_v52 = vld [vmem:[#allocation5 + $0x80] sm:$0xf] }
  0x4e   :  { %652 = vmatpush.bf16.msra.mxu0 %v1544_v27  ;;  %v1600_v55 = vor.u32 %v2033_v53, %v1599_v52  ;;  %v225_v27 = vperm.slane %v222_v12, 1 }
  0x50   :  { %678 = vmatpush.bf16.msra.mxu2 %v1548_v59  ;;  %v2053_v59 = vld [vmem:[%s2901_s3 + $0x124] sm:$0xf0] }
  0x51   :  { %691 = vmatpush.bf16.msra.mxu3 %v1612_v63 }
  0x52   :  { %653 = vmatpush.bf16.msra.mxu0 %v1536_v40  ;;  %v715_v40 = vld [vmem:[%s2905_s7 + $0x58] sm:$0xff] }
  0x54   :  { %679 = vmatpush.bf16.msra.mxu2 %v1540_v10 }
  0x55   :  { %692 = vmatpush.bf16.msra.mxu3 %v1604_v17  ;;  %v224_v17 = vperm.slane %v222_v12, 0  ;;  %v705_v12 = vld [vmem:[%s2905_s7 + $0x8] sm:$0xff] }
  0x91   :  { %v113_v57 = vpop.f32.mrf.mxu0  ;;  %v133_v58 = vpop.f32.mrf.mxu1 }
  0x92   :  { %v114_v61 = vadd.f32 %v113_v57, %v84_v46  ;;  %v134_v62 = vadd.f32 %v133_v58, %v85_v47  ;;  %v1608_v46 = vor.u32 %v2035_v44, %v1607_v43  ;;  %v2075_v47 = vld [vmem:[%s2901_s3 + $0x1d4] sm:$0xf0]  ;;  %v1793_v57 = vor.u32 %v2073_v56, %v1792_v54  ;;  %v1712_v58 = vld [vmem:[%s2901_s3 + $0x120] sm:$0xf]  ;;  %v714_v44 = vld [vmem:[%s2905_s7 + $0x50] sm:$0xff] }
  0x93   :  { %v1801_v48 = vor.u32 %v2075_v47, %v1800_v45  ;;  %v1713_v60 = vor.u32 %v2053_v59, %v1712_v58  ;;  %v731_v45 = vld [vmem:[%s2905_s7 + $0xd8] sm:$0xff]  ;;  %v713_v47 = vld [vmem:[%s2905_s7 + $0x48] sm:$0xff]  ;;  %v712_v54 = vld [vmem:[%s2905_s7 + $0x40] sm:$0xff]  ;;  %v87_v56 = vperm.slane %v2467_v32, 3 }
  0x94   :  { %vm176_vm1 = vcmp.gt.f32.partialorder %v114_v61, 0.0  ;;  %v180_v2 = vmul.f32 0.01, %v114_v61  ;;  %vm177_vm2 = vcmp.gt.f32.partialorder %v134_v62, 0.0  ;;  %v181_v3 = vmul.f32 0.01, %v134_v62  ;;  %665 = vmatpush.bf16.msra.mxu1 %v1608_v46 }
  0x95   :  { %v711_v58 = vld [vmem:[%s2905_s7 + $0x38] sm:$0xff]  ;;  %v728_v59 = vld [vmem:[%s2905_s7 + $0xc0] sm:$0xff] }
  0x96   :  { %v184_v6 = vsel %vm176_vm1, %v114_v61, %v180_v2  ;;  %v185_v7 = vsel %vm177_vm2, %v134_v62, %v181_v3  ;;  %v1784_v61 = vld [vmem:[%s2901_s3 + $0x1b0] sm:$0xf]  ;;  %v2071_v62 = vld [vmem:[%s2901_s3 + $0x1b4] sm:$0xf0]  ;;  %v1776_v2 = vld [vmem:[%s2901_s3 + $0x1a0] sm:$0xf]  ;;  %v1705_v3 = vor.u32 %v2051_v1, %v1704_v0 }
  0x97   :  { %v188_v8 = vpack.c.bf16 %v184_v6, %v184_v6  ;;  %v189_v9 = vpack.c.bf16 %v185_v7, %v185_v7  ;;  %v1785_v63 = vor.u32 %v2071_v62, %v1784_v61  ;;  %v2049_v6 = vld [vmem:[%s2901_s3 + $0x104] sm:$0xf0]  ;;  %v1777_v7 = vor.u32 %v2069_v4, %v1776_v2  ;;  %v726_v0 = vld [vmem:[%s2905_s7 + $0xb0] sm:$0xff]  ;;  %v708_v1 = vld [vmem:[%s2905_s7 + $0x20] sm:$0xff] }
  0x98   :  { %666 = vmatpush.bf16.msra.mxu1 %v1600_v55  ;;  %v1697_v10 = vor.u32 %v2049_v6, %v1696_v5  ;;  %v729_v55 = vld [vmem:[%s2905_s7 + $0xc8] sm:$0xff]  ;;  %v707_v5 = vld [vmem:[%s2905_s7 + $0x18] sm:$0xff]  ;;  %v724_v6 = vld [vmem:[%s2905_s7 + $0xa0] sm:$0xff] }
  0x99   :  { %396 = vmatmul.bf16.vlgmr.msrb.gmra.mxu0 %v188_v8  ;;  %409 = vmatmul.bf16.vlgmr.msrb.gmra.mxu1 %v189_v9  ;;  %v153_v18 = vpop.f32.mrf.mxu2  ;;  %v725_v4 = vld [vmem:[%s2905_s7 + $0xa8] sm:$0xff] }
  0x9a   :  { %422 = vmatmul.bf16.vlgmr.msrb.gmra.mxu2 %v188_v8  ;;  %435 = vmatmul.bf16.vlgmr.msrb.gmra.mxu3 %v189_v9  ;;  %v1768_v8 = vld [vmem:[%s2901_s3 + $0x190] sm:$0xf]  ;;  %v2067_v9 = vld [vmem:[%s2901_s3 + $0x194] sm:$0xf0] }
  0x9b   :  { %982 = vmatpush.bf16.msrb.mxu2 %v1753_v11  ;;  %995 = vmatpush.bf16.msrb.mxu3 %v1817_v23  ;;  %v1769_v11 = vor.u32 %v2067_v9, %v1768_v8  ;;  %v2570_v16 = vpop.f32.mrf.mxu3  ;;  %v718_v23 = vld [vmem:[%s2905_s7 + $0x70] sm:$0xff] }
  0x9c   :  { %740 = vmatpush.msrb.mxu0 %v719_v22  ;;  %760 = vmatpush.msrb.mxu1 %v735_v26  ;;  %v174_v61 = vadd.f32 %v2570_v16, %v87_v56  ;;  %v2062_v9 = vld [vmem:[%s2901_s3 + $0x174] sm:$0xf]  ;;  %v720_v22 = vld [vmem:[%s2905_s7 + $0x80] sm:$0xff]  ;;  %v1810_v26 = vld [vmem:[%s2901_s3 + $0x1e8] sm:$0xf0] }
  0x9d   :  { %v2048_v56 = vld [vmem:[%s2901_s3 + $0x104] sm:$0xf] }
  0x9e   :  { %741 = vmatpush.msrb.mxu0 %v718_v23  ;;  %761 = vmatpush.msrb.mxu1 %v734_v28  ;;  %vm179_vm6 = vcmp.gt.f32.partialorder %v174_v61, 0.0  ;;  %v1738_v28 = vld [vmem:[%s2901_s3 + $0x158] sm:$0xf0] }
  0x9f   :  { %983 = vmatpush.bf16.msrb.mxu2 %v1745_v14  ;;  %996 = vmatpush.bf16.msrb.mxu3 %v1809_v36  ;;  %v2065_v14 = vld [vmem:[%s2901_s3 + $0x184] sm:$0xf0] }
  0xa0   :  { %v1761_v15 = vor.u32 %v2065_v14, %v1760_v13  ;;  %742 = vmatpush.msrb.mxu0 %v717_v25  ;;  %762 = vmatpush.msrb.mxu1 %v733_v31  ;;  %v722_v13 = vld [vmem:[%s2905_s7 + $0x90] sm:$0xff]  ;;  %v2076_v25 = vld [vmem:[%s2901_s3 + $0x1e4] sm:$0xf] }
  0xa1   :  { %v2056_v31 = vld [vmem:[%s2901_s3 + $0x144] sm:$0xf] }
  0xa2   :  { %743 = vmatpush.msrb.mxu0 %v716_v30  ;;  %763 = vmatpush.msrb.mxu1 %v732_v41 }
  0xa3   :  { %984 = vmatpush.bf16.msrb.mxu2 %v1737_v29  ;;  %997 = vmatpush.bf16.msrb.mxu3 %v1801_v48  ;;  %v730_v48 = vld [vmem:[%s2905_s7 + $0xd0] sm:$0xff] }
  0xa4   :  { %744 = vmatpush.msrb.mxu0 %v715_v40  ;;  %764 = vmatpush.msrb.mxu1 %v731_v45  ;;  %v2074_v40 = vld [vmem:[%s2901_s3 + $0x1d4] sm:$0xf] }
  0xa6   :  { %745 = vmatpush.msrb.mxu0 %v714_v44  ;;  %765 = vmatpush.msrb.mxu1 %v730_v48  ;;  %v2095_v44 = vld [vmem:[#allocation5 + $0x174] sm:$0xf0]  ;;  %v1706_v48 = vld [vmem:[%s2901_s3 + $0x118] sm:$0xf0] }
  0xa7   :  { %985 = vmatpush.bf16.msrb.mxu2 %v1729_v42  ;;  %998 = vmatpush.bf16.msrb.mxu3 %v1793_v57  ;;  %v86_v42 = vperm.slane %v2467_v32, 2  ;;  %v727_v32 = vld [vmem:[%s2905_s7 + $0xb8] sm:$0xff] }
  0xa8   :  { %746 = vmatpush.msrb.mxu0 %v713_v47  ;;  %766 = vmatpush.msrb.mxu1 %v729_v55  ;;  %v2050_v47 = vld [vmem:[%s2901_s3 + $0x114] sm:$0xf] }
  0xa9   :  { %v154_v49 = vadd.f32 %v153_v18, %v86_v42  ;;  %v1818_v18 = vld [vmem:[%s2901_s3 + $0x1f8] sm:$0xf0] }
  0xaa   :  { %747 = vmatpush.msrb.mxu0 %v712_v54  ;;  %767 = vmatpush.msrb.mxu1 %v728_v59  ;;  %v1802_v42 = vld [vmem:[%s2901_s3 + $0x1d8] sm:$0xf0]  ;;  %v2093_v54 = vld [vmem:[#allocation5 + $0x164] sm:$0xf0] }
  0xab   :  { %986 = vmatpush.bf16.msrb.mxu2 %v1721_v51  ;;  %999 = vmatpush.bf16.msrb.mxu3 %v1785_v63  ;;  %v182_v57 = vmul.f32 0.01, %v154_v49  ;;  %vm178_vm5 = vcmp.gt.f32.partialorder %v154_v49, 0.0  ;;  %v709_v63 = vld [vmem:[%s2905_s7 + $0x28] sm:$0xff]  ;;  %v1805_v45 = vor.u32 %v2074_v40, %v1802_v42  ;;  %v2092_v40 = vld [vmem:[#allocation5 + $0x164] sm:$0xf] }
  0xac   :  { %748 = vmatpush.msrb.mxu0 %v711_v58  ;;  %768 = vmatpush.msrb.mxu1 %v727_v32  ;;  %v2070_v58 = vld [vmem:[%s2901_s3 + $0x1b4] sm:$0xf] }
  0xad   :  { %v186_v62 = vsel %vm178_vm5, %v154_v49, %v182_v57  ;;  %v2072_v49 = vld [vmem:[%s2901_s3 + $0x1c4] sm:$0xf]  ;;  %v1698_v57 = vld [vmem:[%s2901_s3 + $0x108] sm:$0xf0] }
  0xae   :  { %v2641_v2 = vpack.c.bf16 %v186_v62, %v186_v62  ;;  %769 = vmatpush.msrb.mxu1 %v726_v0  ;;  %v1701_v59 = vor.u32 %v2048_v56, %v1698_v57  ;;  %v2091_v62 = vld [vmem:[#allocation5 + $0x154] sm:$0xf0]  ;;  %v2068_v0 = vld [vmem:[%s2901_s3 + $0x1a4] sm:$0xf]  ;;  %v2090_v56 = vld [vmem:[#allocation5 + $0x154] sm:$0xf] }
  0xaf   :  { %987 = vmatpush.bf16.msrb.mxu2 %v1713_v60  ;;  %1000 = vmatpush.bf16.msrb.mxu3 %v1777_v7  ;;  %v710_v60 = vld [vmem:[%s2905_s7 + $0x30] sm:$0xff]  ;;  %v1867_v57 = vld [vmem:[#allocation5 + $0x158] sm:$0xf0] }
  0xb0   :  { %749 = vmatpush.msrb.mxu0 %v710_v60  ;;  %v706_v7 = vld [vmem:[%s2905_s7 + $0x10] sm:$0xff]  ;;  %770 = vmatpush.msrb.mxu1 %v725_v4  ;;  %v1786_v60 = vld [vmem:[%s2901_s3 + $0x1b8] sm:$0xf0]  ;;  %v1857_v4 = vld [vmem:[#allocation5 + $0x140] sm:$0xf] }
  0xb1   :  { %v1789_v32 = vor.u32 %v2070_v58, %v1786_v60 }
  0xb2   :  { %750 = vmatpush.msrb.mxu0 %v709_v63  ;;  %771 = vmatpush.msrb.mxu1 %v724_v6 }
  0xb3   :  { %988 = vmatpush.bf16.msrb.mxu2 %v1705_v3  ;;  %1001 = vmatpush.bf16.msrb.mxu3 %v1769_v11  ;;  %v183_v3 = vmul.f32 0.01, %v174_v61  ;;  %v723_v11 = vld [vmem:[%s2905_s7 + $0x98] sm:$0xff] }
  0xb4   :  { %751 = vmatpush.msrb.mxu0 %v708_v1  ;;  %772 = vmatpush.msrb.mxu1 %v723_v11  ;;  %v1778_v1 = vld [vmem:[%s2901_s3 + $0x1a8] sm:$0xf0]  ;;  %v2087_v11 = vld [vmem:[#allocation5 + $0x134] sm:$0xf0] }
  0xb5   :  { %v187_v8 = vsel %vm179_vm6, %v174_v61, %v183_v3  ;;  %v1865_v61 = vld [vmem:[#allocation5 + $0x150] sm:$0xf]  ;;  %v1781_v3 = vor.u32 %v2068_v0, %v1778_v1  ;;  %v1870_v1 = vor.u32 %v2090_v56, %v1867_v57  ;;  %v1899_v57 = vld [vmem:[#allocation5 + $0x198] sm:$0xf0] }
  0xb6   :  { %752 = vmatpush.msrb.mxu0 %v707_v5  ;;  %v2671_v14 = vpack.c.bf16 %v187_v8, %v187_v8  ;;  %773 = vmatpush.msrb.mxu1 %v722_v13  ;;  %v1866_v63 = vor.u32 %v2091_v62, %v1865_v61  ;;  %v2089_v5 = vld [vmem:[#allocation5 + $0x144] sm:$0xf0]  ;;  %v1770_v8 = vld [vmem:[%s2901_s3 + $0x198] sm:$0xf0]  ;;  %v2064_v13 = vld [vmem:[%s2901_s3 + $0x184] sm:$0xf] }
  0xb7   :  { %989 = vmatpush.bf16.msrb.mxu2 %v1697_v10  ;;  %1002 = vmatpush.bf16.msrb.mxu3 %v1761_v15  ;;  %v1754_v10 = vld [vmem:[%s2901_s3 + $0x178] sm:$0xf0]  ;;  %v704_v15 = vld [vmem:[%s2905_s7] sm:$0xff]  ;;  %v1858_v6 = vor.u32 %v2089_v5, %v1857_v4  ;;  %v1939_v61 = vld [vmem:[#allocation5 + $0x1e8] sm:$0xf0] }
  0xb8   :  { %753 = vmatpush.msrb.mxu0 %v706_v7  ;;  %v1757_v16 = vor.u32 %v2062_v9, %v1754_v10  ;;  %v2066_v7 = vld [vmem:[%s2901_s3 + $0x194] sm:$0xf]  ;;  %v1849_v10 = vld [vmem:[#allocation5 + $0x130] sm:$0xf]  ;;  %v1859_v4 = vld [vmem:[#allocation5 + $0x148] sm:$0xf0] }
  0xb9   :  { %v1773_v9 = vor.u32 %v2066_v7, %v1770_v8  ;;  %v1929_v62 = vld [vmem:[#allocation5 + $0x1d0] sm:$0xf]  ;;  %v2780_v8 = vld [vmem:[%s2902_s4 + $0x2] sm:$0x3] }
  0xba   :  { %754 = vmatpush.msrb.mxu0 %v705_v12  ;;  %v1850_v12 = vor.u32 %v2087_v11, %v1849_v10  ;;  %v1931_v10 = vld [vmem:[#allocation5 + $0x1d8] sm:$0xf0] }
  0xbc   :  { %755 = vmatpush.msrb.mxu0 %v704_v15  ;;  %v1762_v15 = vld [vmem:[%s2901_s3 + $0x188] sm:$0xf0] }
 0x116   :  { %v397_v19 = vpop.f32.mrf.mxu0  ;;  %v410_v20 = vpop.f32.mrf.mxu1 }
 0x117   :  { %v398_v21 = vadd.f32 %v397_v19, %v224_v17  ;;  %v2078_v17 = vld [vmem:[%s2901_s3 + $0x1f4] sm:$0xf]  ;;  %v2060_v19 = vld [vmem:[%s2901_s3 + $0x164] sm:$0xf] }
 0x118   :  { %v1821_v23 = vor.u32 %v2078_v17, %v1818_v18  ;;  %v1841_v17 = vld [vmem:[#allocation5 + $0x120] sm:$0xf]  ;;  %v2085_v18 = vld [vmem:[#allocation5 + $0x124] sm:$0xf0] }
 0x119   :  { %v411_v24 = vadd.f32 %v410_v20, %v398_v21  ;;  %v1746_v20 = vld [vmem:[%s2901_s3 + $0x168] sm:$0xf0] }
 0x11a   :  { %v721_v21 = vld [vmem:[%s2905_s7 + $0x88] sm:$0xff] }
 0x11b   :  { %vm440_vm3 = vcmp.gt.f32.partialorder %v411_v24, 0.0  ;;  %v442_v29 = vmul.f32 0.01, %v411_v24  ;;  %774 = vmatpush.msrb.mxu1 %v721_v21  ;;  %v2083_v21 = vld [vmem:[#allocation5 + $0x114] sm:$0xf0] }
 0x11d   :  { %v444_v33 = vsel %vm440_vm3, %v411_v24, %v442_v29  ;;  %v423_v34 = vpop.f32.mrf.mxu2  ;;  %v436_v35 = vpop.f32.mrf.mxu3  ;;  %v1749_v24 = vor.u32 %v2060_v19, %v1746_v20  ;;  %775 = vmatpush.msrb.mxu1 %v720_v22  ;;  %v1813_v29 = vor.u32 %v2076_v25, %v1810_v26  ;;  %v1842_v19 = vor.u32 %v2085_v18, %v1841_v17  ;;  %v1833_v20 = vld [vmem:[#allocation5 + $0x110] sm:$0xf]  ;;  %v1825_v25 = vld [vmem:[#allocation5 + $0x100] sm:$0xf]  ;;  %v2081_v26 = vld [vmem:[#allocation5 + $0x104] sm:$0xf0] }
 0x11e   :  { %v446_v36 = vpack.c.bf16 %v444_v33, %v444_v33  ;;  %v424_v37 = vadd.f32 %v423_v34, %v225_v27  ;;  %v399_v38 = vpop.f32.mrf.mxu0  ;;  %v412_v39 = vpop.f32.mrf.mxu1  ;;  %v2058_v27 = vld [vmem:[%s2901_s3 + $0x154] sm:$0xf]  ;;  %v1730_v33 = vld [vmem:[%s2901_s3 + $0x148] sm:$0xf0]  ;;  %v1834_v22 = vor.u32 %v2083_v21, %v1833_v20 }
 0x11f   :  { %v1741_v30 = vor.u32 %v2058_v27, %v1738_v28  ;;  %v1733_v34 = vor.u32 %v2056_v31, %v1730_v33  ;;  %v2052_v38 = vld [vmem:[%s2901_s3 + $0x124] sm:$0xf]  ;;  %v1714_v39 = vld [vmem:[%s2901_s3 + $0x128] sm:$0xf0]  ;;  %v1826_v27 = vor.u32 %v2081_v26, %v1825_v25  ;;  %v2094_v33 = vld [vmem:[#allocation5 + $0x174] sm:$0xf] }
 0x120   :  { %v437_v43 = vadd.f32 %v436_v35, %v424_v37  ;;  %654 = vmatmul.bf16.vlgmr.msra.gmra.mxu0 %v446_v36  ;;  %680 = vmatmul.bf16.vlgmr.msra.gmra.mxu2 %v446_v36  ;;  %v2054_v35 = vld [vmem:[%s2901_s3 + $0x134] sm:$0xf]  ;;  %v1722_v36 = vld [vmem:[%s2901_s3 + $0x138] sm:$0xf0]  ;;  %v1717_v41 = vor.u32 %v2052_v38, %v1714_v39 }
 0x121   :  { %1008 = vmatpush.bf16.msra.mxu0 %v1757_v16  ;;  %v1725_v37 = vor.u32 %v2054_v35, %v1722_v36  ;;  %v1765_v16 = vor.u32 %v2064_v13, %v1762_v15  ;;  %v2086_v13 = vld [vmem:[#allocation5 + $0x134] sm:$0xf]  ;;  %v1851_v15 = vld [vmem:[#allocation5 + $0x138] sm:$0xf0] }
 0x122   :  { %vm441_vm4 = vcmp.gt.f32.partialorder %v437_v43, 0.0  ;;  %v443_v46 = vmul.f32 0.01, %v437_v43  ;;  %v1854_v18 = vor.u32 %v2086_v13, %v1851_v15  ;;  %v2082_v25 = vld [vmem:[#allocation5 + $0x114] sm:$0xf]  ;;  %v1980_v13 = vld [vmem:[%s2905_s7 + $0x1e8] sm:$0xff] }
 0x123   :  { %v1835_v26 = vld [vmem:[#allocation5 + $0x118] sm:$0xf0]  ;;  %v1964_v15 = vld [vmem:[%s2905_s7 + $0x168] sm:$0xff] }
 0x124   :  { %v445_v50 = vsel %vm441_vm4, %v437_v43, %v443_v46  ;;  %v1881_v43 = vld [vmem:[#allocation5 + $0x170] sm:$0xf] }
 0x125   :  { %v447_v51 = vpack.c.bf16 %v445_v50, %v445_v50  ;;  %v425_v52 = vpop.f32.mrf.mxu2  ;;  %v438_v53 = vpop.f32.mrf.mxu3  ;;  %1009 = vmatpush.bf16.msra.mxu0 %v1749_v24  ;;  %v1882_v46 = vor.u32 %v2095_v44, %v1881_v43  ;;  %v1709_v50 = vor.u32 %v2050_v47, %v1706_v48  ;;  %v2110_v47 = vld [vmem:[#allocation5 + $0x1f4] sm:$0xf] }
 0x126   :  { %v1873_v53 = vld [vmem:[#allocation5 + $0x160] sm:$0xf] }
 0x127   :  { %667 = vmatmul.bf16.vlgmr.msra.gmra.mxu1 %v447_v51  ;;  %693 = vmatmul.bf16.vlgmr.msra.gmra.mxu3 %v447_v51  ;;  %v1794_v51 = vld [vmem:[%s2901_s3 + $0x1c8] sm:$0xf0]  ;;  %v1874_v55 = vor.u32 %v2093_v54, %v1873_v53  ;;  %v1937_v53 = vld [vmem:[#allocation5 + $0x1e0] sm:$0xf]  ;;  %v2109_v54 = vld [vmem:[#allocation5 + $0x1e4] sm:$0xf0] }
 0x128   :  { %1021 = vmatpush.bf16.msra.mxu1 %v1821_v23  ;;  %1242 = vmatpush.bf16.msra.mxu2 %v1882_v46  ;;  %v1797_v52 = vor.u32 %v2072_v49, %v1794_v51  ;;  %v480_v23 = vld [vmem:[%s2904_s6] sm:$0x3]  ;;  %v2111_v46 = vld [vmem:[#allocation5 + $0x1f4] sm:$0xf0]  ;;  %v1938_v60 = vor.u32 %v2109_v54, %v1937_v53  ;;  %v1897_v53 = vld [vmem:[#allocation5 + $0x190] sm:$0xf] }
 0x129   :  { %1010 = vmatpush.bf16.msra.mxu0 %v1741_v30  ;;  %v482_v28 = vperm.slane %v480_v23, 0  ;;  %v483_v36 = vperm.slane %v480_v23, 1  ;;  %v2099_v54 = vld [vmem:[#allocation5 + $0x194] sm:$0xf0] }
 0x12a   :  { %v1898_v56 = vor.u32 %v2099_v54, %v1897_v53 }
 0x12c   :  { %1022 = vmatpush.bf16.msra.mxu1 %v1813_v29  ;;  %1243 = vmatpush.bf16.msra.mxu2 %v1874_v55 }
 0x12d   :  { %1011 = vmatpush.bf16.msra.mxu0 %v1733_v34  ;;  %v1883_v34 = vld [vmem:[#allocation5 + $0x178] sm:$0xf0] }
 0x12e   :  { %v1886_v39 = vor.u32 %v2094_v33, %v1883_v34  ;;  %v1827_v33 = vld [vmem:[#allocation5 + $0x108] sm:$0xf0] }
 0x130   :  { %990 = vmatmul.bf16.vlgmr.msrb.gmra.mxu2 %v2641_v2  ;;  %1023 = vmatpush.bf16.msra.mxu1 %v1805_v45  ;;  %v1945_v45 = vld [vmem:[#allocation5 + $0x1f0] sm:$0xf] }
 0x131   :  { %1012 = vmatpush.bf16.msra.mxu0 %v1725_v37  ;;  %1244 = vmatpush.bf16.msra.mxu2 %v1866_v63  ;;  %v1946_v51 = vor.u32 %v2111_v46, %v1945_v45  ;;  %v2107_v63 = vld [vmem:[#allocation5 + $0x1d4] sm:$0xf0]  ;;  %v1915_v45 = vld [vmem:[#allocation5 + $0x1b8] sm:$0xf0] }
 0x133   :  { %1255 = vmatpush.bf16.msra.mxu3 %v1946_v51  ;;  %v1907_v51 = vld [vmem:[#allocation5 + $0x1a8] sm:$0xf0] }
 0x134   :  { %1024 = vmatpush.bf16.msra.mxu1 %v1797_v52  ;;  %v1947_v52 = vld [vmem:[#allocation5 + $0x1f8] sm:$0xf0] }
 0x135   :  { %1013 = vmatpush.bf16.msra.mxu0 %v1717_v41  ;;  %1245 = vmatpush.bf16.msra.mxu2 %v1858_v6  ;;  %v1875_v41 = vld [vmem:[#allocation5 + $0x168] sm:$0xf0]  ;;  %v1930_v6 = vor.u32 %v2107_v63, %v1929_v62 }
 0x136   :  { %v1891_v62 = vld [vmem:[#allocation5 + $0x188] sm:$0xf0] }
 0x137   :  { %1003 = vmatmul.bf16.vlgmr.msrb.gmra.mxu3 %v2671_v14 }
 0x138   :  { %1025 = vmatpush.bf16.msra.mxu1 %v1789_v32  ;;  %v2108_v32 = vld [vmem:[#allocation5 + $0x1e4] sm:$0xf]  ;;  %1256 = vmatpush.bf16.msra.mxu3 %v1938_v60  ;;  %v2097_v60 = vld [vmem:[#allocation5 + $0x184] sm:$0xf0] }
 0x139   :  { %1014 = vmatpush.bf16.msra.mxu0 %v1709_v50  ;;  %1246 = vmatpush.bf16.msra.mxu2 %v1850_v12  ;;  %v1878_v50 = vor.u32 %v2092_v40, %v1875_v41  ;;  %v1942_v5 = vor.u32 %v2108_v32, %v1939_v61  ;;  %v1913_v41 = vld [vmem:[#allocation5 + $0x1b0] sm:$0xf]  ;;  %v2096_v32 = vld [vmem:[#allocation5 + $0x184] sm:$0xf] }
 0x13a   :  { %v1894_v63 = vor.u32 %v2096_v32, %v1891_v62 }
 0x13c   :  { %1026 = vmatpush.bf16.msra.mxu1 %v1781_v3  ;;  %v2088_v3 = vld [vmem:[#allocation5 + $0x144] sm:$0xf]  ;;  %1257 = vmatpush.bf16.msra.mxu3 %v1930_v6 }
 0x13d   :  { %1015 = vmatpush.bf16.msra.mxu0 %v1701_v59  ;;  %1247 = vmatpush.bf16.msra.mxu2 %v1842_v19  ;;  %v1950_v59 = vor.u32 %v2110_v47, %v1947_v52  ;;  %v1862_v12 = vor.u32 %v2088_v3, %v1859_v4  ;;  %v1843_v19 = vld [vmem:[#allocation5 + $0x128] sm:$0xf0]  ;;  %v1905_v47 = vld [vmem:[#allocation5 + $0x1a0] sm:$0xf] }
 0x140   :  { %1027 = vmatpush.bf16.msra.mxu1 %v1773_v9  ;;  %v2106_v9 = vld [vmem:[#allocation5 + $0x1d4] sm:$0xf] }
 0x141   :  { %1248 = vmatpush.bf16.msra.mxu2 %v1834_v22  ;;  %v1934_v17 = vor.u32 %v2106_v9, %v1931_v10  ;;  %v1981_v9 = vld [vmem:[%s2905_s7 + $0x1f0] sm:$0xff]  ;;  %v819_v10 = vperm.slane %v2780_v8, 1 }
 0x144   :  { %1028 = vmatpush.bf16.msra.mxu1 %v1765_v16  ;;  %v818_v16 = vperm.slane %v2780_v8, 0  ;;  %v1979_v8 = vld [vmem:[%s2905_s7 + $0x1e0] sm:$0xff] }
 0x145   :  { %1249 = vmatpush.bf16.msra.mxu2 %v1826_v27 }
 0x19d   :  { %v655_v24 = vpop.f32.mrf.mxu0 }
 0x19e   :  { %v656_v29 = vadd.f32 %v655_v24, %v482_v28 }
 0x1a3   :  { %v681_v30 = vpop.f32.mrf.mxu2 }
 0x1a4   :  { %v668_v31 = vpop.f32.mrf.mxu1  ;;  %v682_v42 = vadd.f32 %v681_v30, %v483_v36  ;;  %v2105_v36 = vld [vmem:[#allocation5 + $0x1c4] sm:$0xf0] }
 0x1a5   :  { %v669_v35 = vadd.f32 %v668_v31, %v656_v29  ;;  %v657_v37 = vpop.f32.mrf.mxu0  ;;  %v1838_v29 = vor.u32 %v2082_v25, %v1835_v26  ;;  %v2080_v31 = vld [vmem:[#allocation5 + $0x104] sm:$0xf]  ;;  %v1976_v25 = vld [vmem:[%s2905_s7 + $0x1c8] sm:$0xff] }
 0x1a6   :  { %v1830_v34 = vor.u32 %v2080_v31, %v1827_v33  ;;  %v2104_v37 = vld [vmem:[#allocation5 + $0x1c4] sm:$0xf]  ;;  %v1974_v31 = vld [vmem:[%s2905_s7 + $0x1b8] sm:$0xff] }
 0x1a7   :  { %vm698_vm7 = vcmp.gt.f32.partialorder %v669_v35, 0.0  ;;  %v700_v38 = vmul.f32 0.3, %v669_v35  ;;  %v1959_v33 = vld [vmem:[%s2905_s7 + $0x140] sm:$0xff] }
 0x1a9   :  { %v702_v43 = vsel %vm698_vm7, %v669_v35, %v700_v38  ;;  %v1921_v35 = vld [vmem:[#allocation5 + $0x1c0] sm:$0xf] }
 0x1aa   :  { %v694_v44 = vpop.f32.mrf.mxu3  ;;  %756 = vmatmul.f32.vlgmr.msrb.gmra.mxu0 %v702_v43  ;;  %v1922_v38 = vor.u32 %v2105_v36, %v1921_v35  ;;  %v2102_v43 = vld [vmem:[#allocation5 + $0x1b4] sm:$0xf]  ;;  %v1972_v35 = vld [vmem:[%s2905_s7 + $0x1a8] sm:$0xff] }
 0x1ab   :  { %v695_v48 = vadd.f32 %v694_v44, %v682_v42  ;;  %1268 = vmatpush.bf16.msrb.mxu0 %v1886_v39  ;;  %v683_v49 = vpop.f32.mrf.mxu2  ;;  %v1923_v39 = vld [vmem:[#allocation5 + $0x1c8] sm:$0xf0]  ;;  %v2103_v42 = vld [vmem:[#allocation5 + $0x1b4] sm:$0xf0]  ;;  %v1918_v46 = vor.u32 %v2102_v43, %v1915_v45  ;;  %v1957_v36 = vld [vmem:[%s2905_s7 + $0x130] sm:$0xff] }
 0x1ac   :  { %v670_v55 = vpop.f32.mrf.mxu1  ;;  %v1926_v40 = vor.u32 %v2104_v37, %v1923_v39  ;;  %1258 = vmatpush.bf16.msra.mxu3 %v1922_v38  ;;  %v1914_v44 = vor.u32 %v2103_v42, %v1913_v41  ;;  %v2100_v49 = vld [vmem:[#allocation5 + $0x1a4] sm:$0xf]  ;;  %v1970_v39 = vld [vmem:[%s2905_s7 + $0x198] sm:$0xff]  ;;  %v1956_v43 = vld [vmem:[%s2905_s7 + $0x128] sm:$0xff] }
 0x1ad   :  { %vm699_vm8 = vcmp.gt.f32.partialorder %v695_v48, 0.0  ;;  %v701_v58 = vmul.f32 0.3, %v695_v48  ;;  %v1910_v52 = vor.u32 %v2100_v49, %v1907_v51  ;;  %v2098_v55 = vld [vmem:[#allocation5 + $0x194] sm:$0xf]  ;;  %v1971_v37 = vld [vmem:[%s2905_s7 + $0x1a0] sm:$0xff] }
 0x1ae   :  { %v1955_v45 = vld [vmem:[%s2905_s7 + $0x120] sm:$0xff]  ;;  %v1953_v49 = vld [vmem:[%s2905_s7 + $0x110] sm:$0xff] }
 0x1af   :  { %1269 = vmatpush.bf16.msrb.mxu0 %v1878_v50  ;;  %v703_v0 = vsel %vm699_vm8, %v695_v48, %v701_v58  ;;  %v2101_v48 = vld [vmem:[#allocation5 + $0x1a4] sm:$0xf0]  ;;  %v1902_v58 = vor.u32 %v2098_v55, %v1899_v57  ;;  %v1951_v51 = vld [vmem:[%s2905_s7 + $0x100] sm:$0xff] }
 0x1b0   :  { %776 = vmatmul.f32.vlgmr.msrb.gmra.mxu1 %v703_v0  ;;  %1259 = vmatpush.bf16.msra.mxu3 %v1914_v44  ;;  %v1906_v50 = vor.u32 %v2101_v48, %v1905_v47  ;;  %v1969_v44 = vld [vmem:[%s2905_s7 + $0x190] sm:$0xff]  ;;  %v1954_v47 = vld [vmem:[%s2905_s7 + $0x118] sm:$0xff]  ;;  %v1967_v48 = vld [vmem:[%s2905_s7 + $0x180] sm:$0xff] }
 0x1b1   :  { %1281 = vmatpush.bf16.msrb.mxu1 %v1950_v59  ;;  %v1889_v59 = vld [vmem:[#allocation5 + $0x180] sm:$0xf] }
 0x1b2   :  { %v696_v7 = vpop.f32.mrf.mxu3  ;;  %1016 = vmatmul.bf16.vlgmr.msra.gmra.mxu0 %v2641_v2  ;;  %v2084_v2 = vld [vmem:[#allocation5 + $0x124] sm:$0xf]  ;;  %v1890_v61 = vor.u32 %v2097_v60, %v1889_v59 }
 0x1b3   :  { %1270 = vmatpush.bf16.msrb.mxu0 %v1870_v1  ;;  %v991_v11 = vpop.f32.mrf.mxu2  ;;  %v1846_v24 = vor.u32 %v2084_v2, %v1843_v19  ;;  %v2119_v1 = vld [vmem:[%s2906_s8] ss:$0 sm:$0xff]  ;;  %v1982_v7 = vld [vmem:[%s2905_s7 + $0x1f8] sm:$0xff] }
 0x1b4   :  { %v992_v20 = vadd.f32 %v991_v11, %v818_v16  ;;  %1260 = vmatpush.bf16.msra.mxu3 %v1906_v50  ;;  %v1966_v11 = vld [vmem:[%s2905_s7 + $0x178] sm:$0xff]  ;;  %v1952_v50 = vld [vmem:[%s2905_s7 + $0x108] sm:$0xff] }
 0x1b5   :  { %1282 = vmatpush.bf16.msrb.mxu1 %v1942_v5  ;;  %1338 = vmatpush.msrb.mxu2 %v1966_v11  ;;  %v1978_v2 = vld [vmem:[%s2905_s7 + $0x1d8] sm:$0xff] }
 0x1b7   :  { %1271 = vmatpush.bf16.msrb.mxu0 %v1862_v12  ;;  %v1965_v12 = vld [vmem:[%s2905_s7 + $0x170] sm:$0xff] }
 0x1b8   :  { %1029 = vmatmul.bf16.vlgmr.msra.gmra.mxu1 %v2671_v14  ;;  %1261 = vmatpush.bf16.msra.mxu3 %v1898_v56 }
 0x1b9   :  { %1283 = vmatpush.bf16.msrb.mxu1 %v1934_v17  ;;  %1339 = vmatpush.msrb.mxu2 %v1965_v12  ;;  %v1963_v17 = vld [vmem:[%s2905_s7 + $0x160] sm:$0xff] }
 0x1ba   :  { %v1004_v21 = vpop.f32.mrf.mxu3 }
 0x1bb   :  { %v1005_v22 = vadd.f32 %v1004_v21, %v992_v20  ;;  %1272 = vmatpush.bf16.msrb.mxu0 %v1854_v18  ;;  %v993_v23 = vpop.f32.mrf.mxu2  ;;  %1340 = vmatpush.msrb.mxu2 %v1964_v15  ;;  %v1962_v20 = vld [vmem:[%s2905_s7 + $0x158] sm:$0xff] }
 0x1bc   :  { %1262 = vmatpush.bf16.msra.mxu3 %v1890_v61 }
 0x1bd   :  { %vm1034_vm9 = vcmp.gt.f32.partialorder %v1005_v22, 0.0  ;;  %v1036_v27 = vmul.f32 0.01, %v1005_v22  ;;  %1284 = vmatpush.bf16.msrb.mxu1 %v1926_v40  ;;  %1341 = vmatpush.msrb.mxu2 %v1963_v17 }
 0x1bf   :  { %v1038_v28 = vsel %vm1034_vm9, %v1005_v22, %v1036_v27  ;;  %1273 = vmatpush.bf16.msrb.mxu0 %v1846_v24  ;;  %v1977_v22 = vld [vmem:[%s2905_s7 + $0x1d0] sm:$0xff]  ;;  %1342 = vmatpush.msrb.mxu2 %v1962_v20 }
 0x1c0   :  { %v1040_v30 = vpack.c.bf16 %v1038_v28, %v1038_v28  ;;  %1358 = vmatpush.msrb.mxu3 %v1982_v7  ;;  %v1961_v24 = vld [vmem:[%s2905_s7 + $0x150] sm:$0xff]  ;;  %v1975_v28 = vld [vmem:[%s2905_s7 + $0x1c0] sm:$0xff] }
 0x1c1   :  { %1285 = vmatpush.bf16.msrb.mxu1 %v1918_v46  ;;  %1343 = vmatpush.msrb.mxu2 %v1961_v24  ;;  %v1968_v46 = vld [vmem:[%s2905_s7 + $0x188] sm:$0xff] }
 0x1c2   :  { %v1006_v14 = vpop.f32.mrf.mxu3  ;;  %1250 = vmatmul.bf16.vlgmr.msra.gmra.mxu2 %v1040_v30  ;;  %1359 = vmatpush.msrb.mxu3 %v1981_v9 }
 0x1c3   :  { %1274 = vmatpush.bf16.msrb.mxu0 %v1838_v29  ;;  %v1960_v29 = vld [vmem:[%s2905_s7 + $0x148] sm:$0xff]  ;;  %v1973_v14 = vld [vmem:[%s2905_s7 + $0x1b0] sm:$0xff] }
 0x1c4   :  { %1360 = vmatpush.msrb.mxu3 %v1980_v13  ;;  %1344 = vmatpush.msrb.mxu2 %v1960_v29 }
 0x1c5   :  { %1286 = vmatpush.bf16.msrb.mxu1 %v1910_v52  ;;  %v1822_v52 = vld [vmem:[%s2904_s6 + $0x2] sm:$0x3] }
 0x1c6   :  { %1361 = vmatpush.msrb.mxu3 %v1979_v8  ;;  %1345 = vmatpush.msrb.mxu2 %v1959_v33  ;;  %v1079_v53 = vperm.slane %v1822_v52, 1  ;;  %v1078_v56 = vperm.slane %v1822_v52, 0 }
 0x1c7   :  { %1275 = vmatpush.bf16.msrb.mxu0 %v1830_v34  ;;  %v1958_v34 = vld [vmem:[%s2905_s7 + $0x138] sm:$0xff] }
 0x1c8   :  { %1362 = vmatpush.msrb.mxu3 %v1978_v2  ;;  %1346 = vmatpush.msrb.mxu2 %v1958_v34 }
 0x1c9   :  { %1287 = vmatpush.bf16.msrb.mxu1 %v1902_v58 }
 0x1ca   :  { %1276 = vmatmul.bf16.vlgmr.msrb.gmra.mxu0 %v1040_v30  ;;  %1363 = vmatpush.msrb.mxu3 %v1977_v22 }
 0x1cb   :  { %1347 = vmatpush.msrb.mxu2 %v1957_v36 }
 0x1cc   :  { %1364 = vmatpush.msrb.mxu3 %v1976_v25 }
 0x1cd   :  { %1288 = vmatpush.bf16.msrb.mxu1 %v1894_v63  ;;  %1348 = vmatpush.msrb.mxu2 %v1956_v43 }
 0x1ce   :  { %1365 = vmatpush.msrb.mxu3 %v1975_v28 }
 0x1cf   :  { %1349 = vmatpush.msrb.mxu2 %v1955_v45 }
 0x1d0   :  { %1366 = vmatpush.msrb.mxu3 %v1974_v31 }
 0x1d1   :  { %1350 = vmatpush.msrb.mxu2 %v1954_v47 }
 0x1d2   :  { %1367 = vmatpush.msrb.mxu3 %v1973_v14 }
 0x1d3   :  { %1351 = vmatpush.msrb.mxu2 %v1953_v49 }
 0x1d4   :  { %1368 = vmatpush.msrb.mxu3 %v1972_v35 }
 0x1d5   :  { %1352 = vmatpush.msrb.mxu2 %v1952_v50 }
 0x1d6   :  { %1369 = vmatpush.msrb.mxu3 %v1971_v37 }
 0x1d7   :  { %1353 = vmatpush.msrb.mxu2 %v1951_v51 }
 0x1d8   :  { %1370 = vmatpush.msrb.mxu3 %v1970_v39 }
 0x1da   :  { %1371 = vmatpush.msrb.mxu3 %v1969_v44 }
 0x1dc   :  { %1372 = vmatpush.msrb.mxu3 %v1968_v46 }
 0x1de   :  { %1373 = vmatpush.msrb.mxu3 %v1967_v48 }
 0x227   :  { %v757_v0 = vpop.f32.mrf.mxu0 }
 0x228   :  { %v758_v3 = vadd.f32 %v2119_v1, %v757_v0 }
 0x22d   :  { %v777_v4 = vpop.f32.mrf.mxu1 }
 0x22e   :  { %v778_v5 = vadd.f32 %v777_v4, %v758_v3  ;;  %v2120_v3 = vld [vmem:[%s2906_s8 + $0x1] ss:$0 sm:$0xff] }
 0x22f   :  { %v1017_v6 = vpop.f32.mrf.mxu0 }
 0x230   :  { %1379 = vst.msk [vmem:[#allocation7] sm:$0xff] %vm1378_vm10, %v778_v5  ;;  %v1018_v16 = vadd.f32 %v1017_v6, %v819_v10 }
 0x235   :  { %v1030_v18 = vpop.f32.mrf.mxu1 }
 0x236   :  { %v1031_v19 = vadd.f32 %v1030_v18, %v1018_v16 }
 0x237   :  { %v1019_v21 = vpop.f32.mrf.mxu0 }
 0x238   :  { %vm1035_vm11 = vcmp.gt.f32.partialorder %v1031_v19, 0.0  ;;  %v1037_v23 = vmul.f32 0.01, %v1031_v19 }
 0x23a   :  { %v1039_v26 = vsel %vm1035_vm11, %v1031_v19, %v1037_v23 }
 0x23b   :  { %v1041_v27 = vpack.c.bf16 %v1039_v26, %v1039_v26 }
 0x23d   :  { %v1032_v30 = vpop.f32.mrf.mxu1  ;;  %1263 = vmatmul.bf16.vlgmr.msra.gmra.mxu3 %v1041_v27  ;;  %1289 = vmatmul.bf16.vlgmr.msrb.gmra.mxu1 %v1041_v27 }
 0x245   :  { %v1251_v38 = vpop.f32.mrf.mxu2 }
 0x246   :  { %v1252_v59 = vadd.f32 %v1251_v38, %v1078_v56 }
 0x247   :  { %v1277_v40 = vpop.f32.mrf.mxu0 }
 0x248   :  { %v1278_v54 = vadd.f32 %v1277_v40, %v1079_v53 }
 0x24d   :  { %v1253_v41 = vpop.f32.mrf.mxu2 }
 0x24f   :  { %v1279_v42 = vpop.f32.mrf.mxu0 }
 0x2ba   :  { %v1290_v55 = vpop.f32.mrf.mxu1 }
 0x2bb   :  { %v1291_v57 = vadd.f32 %v1290_v55, %v1278_v54 }
 0x2bd   :  { %vm1295_vm12 = vcmp.gt.f32.partialorder %v1291_v57, 0.0  ;;  %v1297_v58 = vmul.f32 0.3, %v1291_v57 }
 0x2bf   :  { %v1299_v60 = vsel %vm1295_vm12, %v1291_v57, %v1297_v58 }
 0x2c0   :  { %v1264_v32 = vpop.f32.mrf.mxu3  ;;  %1374 = vmatmul.f32.vlgmr.msrb.gmra.mxu3 %v1299_v60 }
 0x2c1   :  { %v1265_v61 = vadd.f32 %v1264_v32, %v1252_v59 }
 0x2c2   :  { %v1292_v62 = vpop.f32.mrf.mxu1 }
 0x2c3   :  { %vm1294_vm13 = vcmp.gt.f32.partialorder %v1265_v61, 0.0  ;;  %v1296_v63 = vmul.f32 0.3, %v1265_v61 }
 0x2c5   :  { %v1298_v0 = vsel %vm1294_vm13, %v1265_v61, %v1296_v63 }
 0x2c6   :  { %1354 = vmatmul.f32.vlgmr.msrb.gmra.mxu2 %v1298_v0 }
 0x2c8   :  { %v1266_v1 = vpop.f32.mrf.mxu3 }
 0x343   :  { %v1375_v6 = vpop.f32.mrf.mxu3 }
 0x349   :  { %v1355_v4 = vpop.f32.mrf.mxu2 }
 0x34a   :  { %v1356_v5 = vadd.f32 %v2120_v3, %v1355_v4 }
 0x34c   :  { %v1376_v7 = vadd.f32 %v1375_v6, %v1356_v5 }
 0x34e   :  { %1380 = vst.msk [vmem:[#allocation7 + $0x8] sm:$0xff] %vm1378_vm10, %v1376_v7 }
 0x34f   :  { %1393 = dma.vmem_to_hbm [thread:$0]  %s1386_s27, 256, %s1388_s30, [#allocation4], %s2203_s21, %s2203_s21, %s2204_s22  }
 0x350   :  { %2197 = dma.done.wait [#allocation4], 256  }
 0x351   :  { %2198 = vsyncadd [#allocation4], 4294967040 }
 0x352   :  { %1398 = vsyncpa [#allocation3], 1 }
 0x353   :  { %1399 = vsyncpa [#allocation6], 1 }
 0x354   :  { %1400 = vsyncpa [#allocation4], 1 }

</bundles_post_ra>
